<compile_context>
chip_gen: v7x
topology: tpu7x:2x2x1
jax: 0.10.0
libtpu: 0.0.40
codegen_flags: <defaults>
</compile_context>

<pallas_src>
import functools

import jax
import jax.numpy as jnp
from jax import lax
from jax.experimental import pallas as pl
from jax.experimental.pallas import tpu as pltpu


# ----------------------------------------------------------------------------
# Fused kernel: the entire RA.forward for one block of Bt batch elements.
#   x_ref    : (Bt, Cin, N)      N = H*W, spatial on lanes
#   y_ref    : (Bt, N)
#   w0_ref   : (Cout, Cin)       1x1 convert weight
#   ss_ref   : (Cout, 8)         folded BN [scale0, shift0, ..., scale3, shift3]
#   w123_ref : (3, Cout, 9*Cout) conv1..3 weights (tap-major, channel-minor cols)
#   w4_ref   : (Cout, 9)         conv4 weight, column t = tap 3*ky+kx
#   b4_ref   : (1, 1)            conv4 bias
#   masks_ref: (9, N)            0/1 validity mask per tap ("same" padding)
#   o_ref    : (Bt, N)           y + convs(sigmoid(-y) * relu(bn(convert(x))))
# ----------------------------------------------------------------------------
def _ra_kernel(x_ref, y_ref, w0_ref, ss_ref, w123_ref, w4_ref, b4_ref,
               masks_ref, o_ref, *, width):
    Bt, Cin, N = x_ref.shape
    Cout = w0_ref.shape[0]
    W = width

    # Tap order t = 3*ky + kx, displacement (dy, dx) = (ky-1, kx-1),
    # flat displacement delta = dy*W + dx in the compact row-major layout.
    deltas = [(ky - 1) * W + (kx - 1) for ky in range(3) for kx in range(3)]

    ss = ss_ref[...]          # (Cout, 8)
    w0 = w0_ref[...]          # (Cout, Cin)
    w4 = w4_ref[...]          # (Cout, 9)
    b4 = b4_ref[...]          # (1, 1)
    masks = masks_ref[...]    # (9, N)
    yv = y_ref[...]           # (Bt, N)

    def taps_of(z):
        """9 shifted+masked copies of z (Cout, N); shifts run on the XLU."""
        taps = []
        for t, d in enumerate(deltas):
            if d == 0:
                taps.append(z)                       # centre tap: always valid
                continue
            # want shifted[:, s] = z[:, s + d];  pltpu.roll == jnp.roll:
            #   roll(z, k)[:, s] = z[:, (s - k) % N]   ->   k = (-d) % N
            shifted = pltpu.roll(z, (-d) % N, axis=1)
            taps.append(shifted * masks[t:t + 1, :])  # zero invalid neighbours
        return taps

    rows = []
    for bt in range(Bt):
        xb = x_ref[bt]                               # (Cin, N)
        yb = yv[bt:bt + 1, :]                        # (1, N)

        # ---- layer 0: 1x1 conv + BN + ReLU + reverse-attention multiply ----
        z = jnp.dot(w0, xb, preferred_element_type=jnp.float32)    # (Cout, N)
        z = jnp.maximum(z * ss[:, 0:1] + ss[:, 1:2], 0.0)
        z = jax.nn.sigmoid(-yb) * z

        # ---- layers 1..3: 3x3 conv (sublane im2col, one deep-K MXU matmul)
        #      + BN + ReLU.  Activations never leave VMEM/vregs. ------------
        for l in range(3):
            patches = jnp.concatenate(taps_of(z), axis=0)          # (9*Cout, N)
            z = jnp.dot(w123_ref[l], patches,
                        preferred_element_type=jnp.float32)        # (Cout, N)
            z = jnp.maximum(z * ss[:, 2 * l + 2:2 * l + 3]
                            + ss[:, 2 * l + 3:2 * l + 4], 0.0)

        # ---- layer 4: 3x3 conv Cout->1 (+bias): 9 VPU FMAs + one sublane
        #      reduce, fused with the residual add of y. --------------------
        taps4 = taps_of(z)
        acc = taps4[0] * w4[:, 0:1]
        for t in range(1, 9):
            acc = acc + taps4[t] * w4[:, t:t + 1]
        row = jnp.sum(acc, axis=0, keepdims=True) + b4 + yb        # (1, N)
        rows.append(row)

    o_ref[...] = jnp.concatenate(rows, axis=0)                     # (Bt, N)


# ----------------------------------------------------------------------------
# Wrapper (single pallas_call)
# ----------------------------------------------------------------------------
def ra_forward(x_nchw, y_nchw, p, *, batch_tile=None):
    """RA.forward. x: (B, Cin, H, W), y: (B, 1, H, W) -> (B, 1, H, W)."""
    x = x_nchw.astype(jnp.float32)
    y = y_nchw.astype(jnp.float32)
    B, Cin, H, W = x.shape
    Cout = p["w_convert_oihw"].shape[0]
    N = H * W
    K9 = 9 * Cout

    # Coarse grid: Bt batch elements per step (amortise per-step overhead).
    if batch_tile is None:
        Bt = 8 if (B % 8 == 0) else B
    else:
        Bt = batch_tile
    assert B % Bt == 0, "batch_tile must divide B"

    # NCHW is already channel-major -> flattening the spatial dims is free.
    xf = x.reshape(B, Cin, N)
    yf = y.reshape(B, N)

    # Fold BN running stats into per-channel scale/shift and pack params.
    def fold(i, eps=1e-5):
        g, b = p[f"bn{i}_gamma"], p[f"bn{i}_beta"]
        m, v = p[f"bn{i}_mean"], p[f"bn{i}_var"]
        s = g / jnp.sqrt(v + eps)
        return s, b - m * s

    cols = []
    for i in range(4):
        s, sh = fold(i)
        cols += [s, sh]
    ss = jnp.stack(cols, axis=1)                                   # (Cout, 8)

    w0 = p["w_convert_oihw"][:, :, 0, 0]                           # (Cout, Cin)
    w123 = jnp.stack(
        [jnp.transpose(p[f"w_conv{i}_oihw"], (0, 2, 3, 1)).reshape(Cout, K9)
         for i in (1, 2, 3)], axis=0)                              # (3, Cout, 9*Cout)
    w4 = p["w_conv4_oihw"][0].reshape(Cout, 9)                     # (Cout, 9)
    b4 = p["b_conv4"].reshape(1, 1)

    # Per-tap validity masks: zero wherever the 3x3 neighbour falls outside
    # the image (implements "same" padding for the rolled taps).
    ii = jnp.arange(N, dtype=jnp.int32) // W
    jj = jnp.arange(N, dtype=jnp.int32) % W
    mask_rows = []
    for ky in range(3):
        for kx in range(3):
            dy, dx = ky - 1, kx - 1
            valid = ((ii + dy >= 0) & (ii + dy < H)
                     & (jj + dx >= 0) & (jj + dx < W))
            mask_rows.append(valid.astype(jnp.float32))
    masks = jnp.stack(mask_rows, axis=0)                           # (9, N)

    kernel = functools.partial(_ra_kernel, width=W)

    def full(shape):
        return pl.BlockSpec(shape, lambda g, _s=shape: tuple(0 for _ in _s))

    out = pl.pallas_call(
        kernel,
        out_shape=jax.ShapeDtypeStruct((B, N), jnp.float32),
        grid=(B // Bt,),
        in_specs=[
            pl.BlockSpec((Bt, Cin, N), lambda g: (g, 0, 0)),
            pl.BlockSpec((Bt, N), lambda g: (g, 0)),
            full((Cout, Cin)),
            full((Cout, 8)),
            full((3, Cout, K9)),
            full((Cout, 9)),
            full((1, 1)),
            full((9, N)),
        ],
        out_specs=pl.BlockSpec((Bt, N), lambda g: (g, 0)),
        compiler_params=pltpu.CompilerParams(dimension_semantics=("parallel",)),
    )(xf, yf, w0, ss, w123, w4, b4, masks)

    return out.reshape(B, 1, H, W)


# ----------------------------------------------------------------------------
# Pure-JAX reference (lax.conv) for the correctness check
# ----------------------------------------------------------------------------
def ra_reference(x, y, p):
    dn = ("NCHW", "OIHW", "NCHW")

    def bn(z, i, eps=1e-5):
        g, b = p[f"bn{i}_gamma"], p[f"bn{i}_beta"]
        m, v = p[f"bn{i}_mean"], p[f"bn{i}_var"]
        s = (g / jnp.sqrt(v + eps)).reshape(1, -1, 1, 1)
        sh = (b - m * g / jnp.sqrt(v + eps)).reshape(1, -1, 1, 1)
        return z * s + sh

    z = lax.conv_general_dilated(x, p["w_convert_oihw"], (1, 1), "VALID",
                                 dimension_numbers=dn)
    z = jnp.maximum(bn(z, 0), 0.0)
    z = jax.nn.sigmoid(-y) * z
    for i in range(1, 4):
        z = lax.conv_general_dilated(z, p[f"w_conv{i}_oihw"], (1, 1), "SAME",
                                     dimension_numbers=dn)
        z = jnp.maximum(bn(z, i), 0.0)
    z = lax.conv_general_dilated(z, p["w_conv4_oihw"], (1, 1), "SAME",
                                 dimension_numbers=dn)
    z = z + p["b_conv4"].reshape(1, 1, 1, 1)
    return y + z


# ----------------------------------------------------------------------------
# Deterministic parameter construction (kaiming-like weights, random BN stats)
# ----------------------------------------------------------------------------
def make_params(key, cin, cout):
    keys = jax.random.split(key, 12)

    def kaiming(k, shape, fan_in):
        return jax.random.normal(k, shape, jnp.float32) * jnp.sqrt(2.0 / fan_in)

    p = {}
    p["w_convert_oihw"] = kaiming(keys[0], (cout, cin, 1, 1), cin)
    for i in range(1, 4):
        p[f"w_conv{i}_oihw"] = kaiming(keys[i], (cout, cout, 3, 3), 9 * cout)
    p["w_conv4_oihw"] = kaiming(keys[4], (1, cout, 3, 3), 9 * cout)
    p["b_conv4"] = jax.random.normal(keys[5], (1, 1), jnp.float32) * 0.1

    # Random (non-identity) BN running stats so the scale/shift fold is really
    # exercised by the self-test.
    for i in range(4):
        k0, k1, k2, k3 = jax.random.split(keys[6 + i], 4)
        p[f"bn{i}_gamma"] = 0.5 + jax.random.uniform(k0, (cout,), jnp.float32)
        p[f"bn{i}_beta"] = jax.random.normal(k1, (cout,), jnp.float32) * 0.1
        p[f"bn{i}_mean"] = jax.random.normal(k2, (cout,), jnp.float32) * 0.1
        p[f"bn{i}_var"] = 0.5 + jax.random.uniform(k3, (cout,), jnp.float32)
    return p


if __name__ == "__main__":
    B, Cin, Cout, H, W = 2, 4, 8, 16, 16
    key = jax.random.PRNGKey(0)
    kx, ky, kp = jax.random.split(key, 3)

    x = jax.random.normal(kx, (B, Cin, H, W), jnp.float32)
    y = jax.random.normal(ky, (B, 1, H, W), jnp.float32)
    params = make_params(kp, Cin, Cout)

    out = jax.block_until_ready(ra_forward(x, y, params))
    ref = jax.block_until_ready(ra_reference(x, y, params))

    assert out.shape == (B, 1, H, W), out.shape
    err = jnp.max(jnp.abs(out - ref))
    assert jnp.allclose(out, ref, atol=2e-4, rtol=2e-4), f"max abs err {err}"
    print("KERNEL_OK")
</pallas_src>

<mosaic_0001>
module attributes {stable_mosaic.version = 11 : i64} {
  func.func @_ra_kernel(%arg0: i32, %arg1: memref<2x4x256xf32, #tpu.memory_space<vmem>>, %arg2: memref<2x256xf32, #tpu.memory_space<vmem>>, %arg3: memref<8x4xf32, #tpu.memory_space<vmem>>, %arg4: memref<8x8xf32, #tpu.memory_space<vmem>>, %arg5: memref<3x8x72xf32, #tpu.memory_space<vmem>>, %arg6: memref<8x9xf32, #tpu.memory_space<vmem>>, %arg7: memref<1x1xf32, #tpu.memory_space<vmem>>, %arg8: memref<9x256xf32, #tpu.memory_space<vmem>>, %arg9: memref<2x256xf32, #tpu.memory_space<vmem>>) attributes {dimension_semantics = [#tpu.dimension_semantics<parallel>], iteration_bounds = array<i64: 1>, scalar_prefetch = 0 : i64, scratch_operands = 0 : i64, tpu.core_type = #tpu.core_type<tc>, window_params = [{transform_indices = @transform_0, window_bounds = array<i64: 2, 4, 256>}, {transform_indices = @transform_1, window_bounds = array<i64: 2, 256>}, {pipeline_mode = #tpu.pipeline_mode<synchronous>, transform_indices = @transform_2, window_bounds = array<i64: 8, 4>}, {pipeline_mode = #tpu.pipeline_mode<synchronous>, transform_indices = @transform_3, window_bounds = array<i64: 8, 8>}, {pipeline_mode = #tpu.pipeline_mode<synchronous>, transform_indices = @transform_4, window_bounds = array<i64: 3, 8, 72>}, {pipeline_mode = #tpu.pipeline_mode<synchronous>, transform_indices = @transform_5, window_bounds = array<i64: 8, 9>}, {pipeline_mode = #tpu.pipeline_mode<synchronous>, transform_indices = @transform_6, window_bounds = array<i64: 1, 1>}, {pipeline_mode = #tpu.pipeline_mode<synchronous>, transform_indices = @transform_7, window_bounds = array<i64: 9, 256>}, {transform_indices = @transform_8, window_bounds = array<i64: 2, 256>}]} {
    %c0 = arith.constant 0 : index
    %c0_0 = arith.constant 0 : index
    %0 = vector.load %arg4[%c0, %c0_0] : memref<8x8xf32, #tpu.memory_space<vmem>>, vector<8x8xf32>
    %c0_1 = arith.constant 0 : index
    %c0_2 = arith.constant 0 : index
    %1 = vector.load %arg3[%c0_1, %c0_2] : memref<8x4xf32, #tpu.memory_space<vmem>>, vector<8x4xf32>
    %c0_3 = arith.constant 0 : index
    %c0_4 = arith.constant 0 : index
    %2 = vector.load %arg6[%c0_3, %c0_4] : memref<8x9xf32, #tpu.memory_space<vmem>>, vector<8x9xf32>
    %c0_5 = arith.constant 0 : index
    %c0_6 = arith.constant 0 : index
    %3 = vector.load %arg7[%c0_5, %c0_6] : memref<1x1xf32, #tpu.memory_space<vmem>>, vector<1x1xf32>
    %c0_7 = arith.constant 0 : index
    %c0_8 = arith.constant 0 : index
    %4 = vector.load %arg8[%c0_7, %c0_8] : memref<9x256xf32, #tpu.memory_space<vmem>>, vector<9x256xf32>
    %c0_9 = arith.constant 0 : index
    %c0_10 = arith.constant 0 : index
    %5 = vector.load %arg2[%c0_9, %c0_10] : memref<2x256xf32, #tpu.memory_space<vmem>>, vector<2x256xf32>
    %c0_11 = arith.constant 0 : index
    %c0_12 = arith.constant 0 : index
    %c0_13 = arith.constant 0 : index
    %6 = vector.load %arg1[%c0_11, %c0_12, %c0_13] : memref<2x4x256xf32, #tpu.memory_space<vmem>>, vector<1x4x256xf32>
    %7 = vector.shape_cast %6 : vector<1x4x256xf32> to vector<4x256xf32>
    %8 = vector.extract_strided_slice %5 {offsets = [0, 0], sizes = [1, 256], strides = [1, 1]} : vector<2x256xf32> to vector<1x256xf32>
    %cst = arith.constant dense<0.000000e+00> : vector<8x256xf32>
    %9 = tpu.matmul %1, %7, %cst {dimension_numbers = #tpu.dot_dimension_numbers<[1], [0], [0], [1], [0, 0, 1, 1], [], []>} : vector<8x4xf32>, vector<4x256xf32>, vector<8x256xf32> -> vector<8x256xf32>
    %10 = vector.extract_strided_slice %0 {offsets = [0, 0], sizes = [8, 1], strides = [1, 1]} : vector<8x8xf32> to vector<8x1xf32>
    %11 = vector.broadcast %10 : vector<8x1xf32> to vector<8x256xf32>
    %12 = arith.mulf %9, %11 : vector<8x256xf32>
    %13 = vector.extract_strided_slice %0 {offsets = [0, 1], sizes = [8, 1], strides = [1, 1]} : vector<8x8xf32> to vector<8x1xf32>
    %14 = vector.broadcast %13 : vector<8x1xf32> to vector<8x256xf32>
    %15 = arith.addf %12, %14 : vector<8x256xf32>
    %cst_14 = arith.constant 0.000000e+00 : f32
    %16 = vector.broadcast %cst_14 : f32 to vector<8x256xf32>
    %17 = arith.maximumf %15, %16 : vector<8x256xf32>
    %cst_15 = arith.constant 0.000000e+00 : f32
    %18 = vector.broadcast %cst_15 : f32 to vector<1x256xf32>
    %19 = arith.subf %18, %8 : vector<1x256xf32>
    %20 = arith.negf %19 : vector<1x256xf32>
    %21 = math.exp %20 : vector<1x256xf32>
    %cst_16 = arith.constant 1.000000e+00 : f32
    %22 = vector.broadcast %cst_16 : f32 to vector<1x256xf32>
    %23 = arith.addf %22, %21 : vector<1x256xf32>
    %24 = arith.divf %22, %23 : vector<1x256xf32>
    %25 = vector.broadcast %24 : vector<1x256xf32> to vector<8x256xf32>
    %26 = arith.mulf %25, %17 : vector<8x256xf32>
    %c17_i32 = arith.constant 17 : i32
    %27 = tpu.dynamic_rotate %26 by %c17_i32 dim 1 : vector<8x256xf32>, i32 -> vector<8x256xf32>
    %28 = vector.extract_strided_slice %4 {offsets = [0, 0], sizes = [1, 256], strides = [1, 1]} : vector<9x256xf32> to vector<1x256xf32>
    %29 = vector.broadcast %28 : vector<1x256xf32> to vector<8x256xf32>
    %30 = arith.mulf %27, %29 : vector<8x256xf32>
    %c16_i32 = arith.constant 16 : i32
    %31 = tpu.dynamic_rotate %26 by %c16_i32 dim 1 : vector<8x256xf32>, i32 -> vector<8x256xf32>
    %32 = vector.extract_strided_slice %4 {offsets = [1, 0], sizes = [1, 256], strides = [1, 1]} : vector<9x256xf32> to vector<1x256xf32>
    %33 = vector.broadcast %32 : vector<1x256xf32> to vector<8x256xf32>
    %34 = arith.mulf %31, %33 : vector<8x256xf32>
    %c15_i32 = arith.constant 15 : i32
    %35 = tpu.dynamic_rotate %26 by %c15_i32 dim 1 : vector<8x256xf32>, i32 -> vector<8x256xf32>
    %36 = vector.extract_strided_slice %4 {offsets = [2, 0], sizes = [1, 256], strides = [1, 1]} : vector<9x256xf32> to vector<1x256xf32>
    %37 = vector.broadcast %36 : vector<1x256xf32> to vector<8x256xf32>
    %38 = arith.mulf %35, %37 : vector<8x256xf32>
    %c1_i32 = arith.constant 1 : i32
    %39 = tpu.dynamic_rotate %26 by %c1_i32 dim 1 : vector<8x256xf32>, i32 -> vector<8x256xf32>
    %40 = vector.extract_strided_slice %4 {offsets = [3, 0], sizes = [1, 256], strides = [1, 1]} : vector<9x256xf32> to vector<1x256xf32>
    %41 = vector.broadcast %40 : vector<1x256xf32> to vector<8x256xf32>
    %42 = arith.mulf %39, %41 : vector<8x256xf32>
    %c255_i32 = arith.constant 255 : i32
    %43 = tpu.dynamic_rotate %26 by %c255_i32 dim 1 : vector<8x256xf32>, i32 -> vector<8x256xf32>
    %44 = vector.extract_strided_slice %4 {offsets = [5, 0], sizes = [1, 256], strides = [1, 1]} : vector<9x256xf32> to vector<1x256xf32>
    %45 = vector.broadcast %44 : vector<1x256xf32> to vector<8x256xf32>
    %46 = arith.mulf %43, %45 : vector<8x256xf32>
    %c241_i32 = arith.constant 241 : i32
    %47 = tpu.dynamic_rotate %26 by %c241_i32 dim 1 : vector<8x256xf32>, i32 -> vector<8x256xf32>
    %48 = vector.extract_strided_slice %4 {offsets = [6, 0], sizes = [1, 256], strides = [1, 1]} : vector<9x256xf32> to vector<1x256xf32>
    %49 = vector.broadcast %48 : vector<1x256xf32> to vector<8x256xf32>
    %50 = arith.mulf %47, %49 : vector<8x256xf32>
    %c240_i32 = arith.constant 240 : i32
    %51 = tpu.dynamic_rotate %26 by %c240_i32 dim 1 : vector<8x256xf32>, i32 -> vector<8x256xf32>
    %52 = vector.extract_strided_slice %4 {offsets = [7, 0], sizes = [1, 256], strides = [1, 1]} : vector<9x256xf32> to vector<1x256xf32>
    %53 = vector.broadcast %52 : vector<1x256xf32> to vector<8x256xf32>
    %54 = arith.mulf %51, %53 : vector<8x256xf32>
    %c239_i32 = arith.constant 239 : i32
    %55 = tpu.dynamic_rotate %26 by %c239_i32 dim 1 : vector<8x256xf32>, i32 -> vector<8x256xf32>
    %56 = vector.extract_strided_slice %4 {offsets = [8, 0], sizes = [1, 256], strides = [1, 1]} : vector<9x256xf32> to vector<1x256xf32>
    %57 = vector.broadcast %56 : vector<1x256xf32> to vector<8x256xf32>
    %58 = arith.mulf %55, %57 : vector<8x256xf32>
    %59 = tpu.concatenate %30, %34, %38, %42, %26, %46, %50, %54, %58 in 0 : vector<8x256xf32>, vector<8x256xf32>, vector<8x256xf32>, vector<8x256xf32>, vector<8x256xf32>, vector<8x256xf32>, vector<8x256xf32>, vector<8x256xf32>, vector<8x256xf32> -> vector<72x256xf32>
    %c0_17 = arith.constant 0 : index
    %c0_18 = arith.constant 0 : index
    %c0_19 = arith.constant 0 : index
    %60 = vector.load %arg5[%c0_17, %c0_18, %c0_19] : memref<3x8x72xf32, #tpu.memory_space<vmem>>, vector<1x8x72xf32>
    %61 = vector.shape_cast %60 : vector<1x8x72xf32> to vector<8x72xf32>
    %cst_20 = arith.constant dense<0.000000e+00> : vector<8x256xf32>
    %62 = tpu.matmul %61, %59, %cst_20 {dimension_numbers = #tpu.dot_dimension_numbers<[1], [0], [0], [1], [0, 0, 1, 1], [], []>} : vector<8x72xf32>, vector<72x256xf32>, vector<8x256xf32> -> vector<8x256xf32>
    %63 = vector.extract_strided_slice %0 {offsets = [0, 2], sizes = [8, 1], strides = [1, 1]} : vector<8x8xf32> to vector<8x1xf32>
    %64 = vector.broadcast %63 : vector<8x1xf32> to vector<8x256xf32>
    %65 = arith.mulf %62, %64 : vector<8x256xf32>
    %66 = vector.extract_strided_slice %0 {offsets = [0, 3], sizes = [8, 1], strides = [1, 1]} : vector<8x8xf32> to vector<8x1xf32>
    %67 = vector.broadcast %66 : vector<8x1xf32> to vector<8x256xf32>
    %68 = arith.addf %65, %67 : vector<8x256xf32>
    %cst_21 = arith.constant 0.000000e+00 : f32
    %69 = vector.broadcast %cst_21 : f32 to vector<8x256xf32>
    %70 = arith.maximumf %68, %69 : vector<8x256xf32>
    %c17_i32_22 = arith.constant 17 : i32
    %71 = tpu.dynamic_rotate %70 by %c17_i32_22 dim 1 : vector<8x256xf32>, i32 -> vector<8x256xf32>
    %72 = vector.extract_strided_slice %4 {offsets = [0, 0], sizes = [1, 256], strides = [1, 1]} : vector<9x256xf32> to vector<1x256xf32>
    %73 = vector.broadcast %72 : vector<1x256xf32> to vector<8x256xf32>
    %74 = arith.mulf %71, %73 : vector<8x256xf32>
    %c16_i32_23 = arith.constant 16 : i32
    %75 = tpu.dynamic_rotate %70 by %c16_i32_23 dim 1 : vector<8x256xf32>, i32 -> vector<8x256xf32>
    %76 = vector.extract_strided_slice %4 {offsets = [1, 0], sizes = [1, 256], strides = [1, 1]} : vector<9x256xf32> to vector<1x256xf32>
    %77 = vector.broadcast %76 : vector<1x256xf32> to vector<8x256xf32>
    %78 = arith.mulf %75, %77 : vector<8x256xf32>
    %c15_i32_24 = arith.constant 15 : i32
    %79 = tpu.dynamic_rotate %70 by %c15_i32_24 dim 1 : vector<8x256xf32>, i32 -> vector<8x256xf32>
    %80 = vector.extract_strided_slice %4 {offsets = [2, 0], sizes = [1, 256], strides = [1, 1]} : vector<9x256xf32> to vector<1x256xf32>
    %81 = vector.broadcast %80 : vector<1x256xf32> to vector<8x256xf32>
    %82 = arith.mulf %79, %81 : vector<8x256xf32>
    %c1_i32_25 = arith.constant 1 : i32
    %83 = tpu.dynamic_rotate %70 by %c1_i32_25 dim 1 : vector<8x256xf32>, i32 -> vector<8x256xf32>
    %84 = vector.extract_strided_slice %4 {offsets = [3, 0], sizes = [1, 256], strides = [1, 1]} : vector<9x256xf32> to vector<1x256xf32>
    %85 = vector.broadcast %84 : vector<1x256xf32> to vector<8x256xf32>
    %86 = arith.mulf %83, %85 : vector<8x256xf32>
    %c255_i32_26 = arith.constant 255 : i32
    %87 = tpu.dynamic_rotate %70 by %c255_i32_26 dim 1 : vector<8x256xf32>, i32 -> vector<8x256xf32>
    %88 = vector.extract_strided_slice %4 {offsets = [5, 0], sizes = [1, 256], strides = [1, 1]} : vector<9x256xf32> to vector<1x256xf32>
    %89 = vector.broadcast %88 : vector<1x256xf32> to vector<8x256xf32>
    %90 = arith.mulf %87, %89 : vector<8x256xf32>
    %c241_i32_27 = arith.constant 241 : i32
    %91 = tpu.dynamic_rotate %70 by %c241_i32_27 dim 1 : vector<8x256xf32>, i32 -> vector<8x256xf32>
    %92 = vector.extract_strided_slice %4 {offsets = [6, 0], sizes = [1, 256], strides = [1, 1]} : vector<9x256xf32> to vector<1x256xf32>
    %93 = vector.broadcast %92 : vector<1x256xf32> to vector<8x256xf32>
    %94 = arith.mulf %91, %93 : vector<8x256xf32>
    %c240_i32_28 = arith.constant 240 : i32
    %95 = tpu.dynamic_rotate %70 by %c240_i32_28 dim 1 : vector<8x256xf32>, i32 -> vector<8x256xf32>
    %96 = vector.extract_strided_slice %4 {offsets = [7, 0], sizes = [1, 256], strides = [1, 1]} : vector<9x256xf32> to vector<1x256xf32>
    %97 = vector.broadcast %96 : vector<1x256xf32> to vector<8x256xf32>
    %98 = arith.mulf %95, %97 : vector<8x256xf32>
    %c239_i32_29 = arith.constant 239 : i32
    %99 = tpu.dynamic_rotate %70 by %c239_i32_29 dim 1 : vector<8x256xf32>, i32 -> vector<8x256xf32>
    %100 = vector.extract_strided_slice %4 {offsets = [8, 0], sizes = [1, 256], strides = [1, 1]} : vector<9x256xf32> to vector<1x256xf32>
    %101 = vector.broadcast %100 : vector<1x256xf32> to vector<8x256xf32>
    %102 = arith.mulf %99, %101 : vector<8x256xf32>
    %103 = tpu.concatenate %74, %78, %82, %86, %70, %90, %94, %98, %102 in 0 : vector<8x256xf32>, vector<8x256xf32>, vector<8x256xf32>, vector<8x256xf32>, vector<8x256xf32>, vector<8x256xf32>, vector<8x256xf32>, vector<8x256xf32>, vector<8x256xf32> -> vector<72x256xf32>
    %c1 = arith.constant 1 : index
    %c0_30 = arith.constant 0 : index
    %c0_31 = arith.constant 0 : index
    %104 = vector.load %arg5[%c1, %c0_30, %c0_31] : memref<3x8x72xf32, #tpu.memory_space<vmem>>, vector<1x8x72xf32>
    %105 = vector.shape_cast %104 : vector<1x8x72xf32> to vector<8x72xf32>
    %cst_32 = arith.constant dense<0.000000e+00> : vector<8x256xf32>
    %106 = tpu.matmul %105, %103, %cst_32 {dimension_numbers = #tpu.dot_dimension_numbers<[1], [0], [0], [1], [0, 0, 1, 1], [], []>} : vector<8x72xf32>, vector<72x256xf32>, vector<8x256xf32> -> vector<8x256xf32>
    %107 = vector.extract_strided_slice %0 {offsets = [0, 4], sizes = [8, 1], strides = [1, 1]} : vector<8x8xf32> to vector<8x1xf32>
    %108 = vector.broadcast %107 : vector<8x1xf32> to vector<8x256xf32>
    %109 = arith.mulf %106, %108 : vector<8x256xf32>
    %110 = vector.extract_strided_slice %0 {offsets = [0, 5], sizes = [8, 1], strides = [1, 1]} : vector<8x8xf32> to vector<8x1xf32>
    %111 = vector.broadcast %110 : vector<8x1xf32> to vector<8x256xf32>
    %112 = arith.addf %109, %111 : vector<8x256xf32>
    %cst_33 = arith.constant 0.000000e+00 : f32
    %113 = vector.broadcast %cst_33 : f32 to vector<8x256xf32>
    %114 = arith.maximumf %112, %113 : vector<8x256xf32>
    %c17_i32_34 = arith.constant 17 : i32
    %115 = tpu.dynamic_rotate %114 by %c17_i32_34 dim 1 : vector<8x256xf32>, i32 -> vector<8x256xf32>
    %116 = vector.extract_strided_slice %4 {offsets = [0, 0], sizes = [1, 256], strides = [1, 1]} : vector<9x256xf32> to vector<1x256xf32>
    %117 = vector.broadcast %116 : vector<1x256xf32> to vector<8x256xf32>
    %118 = arith.mulf %115, %117 : vector<8x256xf32>
    %c16_i32_35 = arith.constant 16 : i32
    %119 = tpu.dynamic_rotate %114 by %c16_i32_35 dim 1 : vector<8x256xf32>, i32 -> vector<8x256xf32>
    %120 = vector.extract_strided_slice %4 {offsets = [1, 0], sizes = [1, 256], strides = [1, 1]} : vector<9x256xf32> to vector<1x256xf32>
    %121 = vector.broadcast %120 : vector<1x256xf32> to vector<8x256xf32>
    %122 = arith.mulf %119, %121 : vector<8x256xf32>
    %c15_i32_36 = arith.constant 15 : i32
    %123 = tpu.dynamic_rotate %114 by %c15_i32_36 dim 1 : vector<8x256xf32>, i32 -> vector<8x256xf32>
    %124 = vector.extract_strided_slice %4 {offsets = [2, 0], sizes = [1, 256], strides = [1, 1]} : vector<9x256xf32> to vector<1x256xf32>
    %125 = vector.broadcast %124 : vector<1x256xf32> to vector<8x256xf32>
    %126 = arith.mulf %123, %125 : vector<8x256xf32>
    %c1_i32_37 = arith.constant 1 : i32
    %127 = tpu.dynamic_rotate %114 by %c1_i32_37 dim 1 : vector<8x256xf32>, i32 -> vector<8x256xf32>
    %128 = vector.extract_strided_slice %4 {offsets = [3, 0], sizes = [1, 256], strides = [1, 1]} : vector<9x256xf32> to vector<1x256xf32>
    %129 = vector.broadcast %128 : vector<1x256xf32> to vector<8x256xf32>
    %130 = arith.mulf %127, %129 : vector<8x256xf32>
    %c255_i32_38 = arith.constant 255 : i32
    %131 = tpu.dynamic_rotate %114 by %c255_i32_38 dim 1 : vector<8x256xf32>, i32 -> vector<8x256xf32>
    %132 = vector.extract_strided_slice %4 {offsets = [5, 0], sizes = [1, 256], strides = [1, 1]} : vector<9x256xf32> to vector<1x256xf32>
    %133 = vector.broadcast %132 : vector<1x256xf32> to vector<8x256xf32>
    %134 = arith.mulf %131, %133 : vector<8x256xf32>
    %c241_i32_39 = arith.constant 241 : i32
    %135 = tpu.dynamic_rotate %114 by %c241_i32_39 dim 1 : vector<8x256xf32>, i32 -> vector<8x256xf32>
    %136 = vector.extract_strided_slice %4 {offsets = [6, 0], sizes = [1, 256], strides = [1, 1]} : vector<9x256xf32> to vector<1x256xf32>
    %137 = vector.broadcast %136 : vector<1x256xf32> to vector<8x256xf32>
    %138 = arith.mulf %135, %137 : vector<8x256xf32>
    %c240_i32_40 = arith.constant 240 : i32
    %139 = tpu.dynamic_rotate %114 by %c240_i32_40 dim 1 : vector<8x256xf32>, i32 -> vector<8x256xf32>
    %140 = vector.extract_strided_slice %4 {offsets = [7, 0], sizes = [1, 256], strides = [1, 1]} : vector<9x256xf32> to vector<1x256xf32>
    %141 = vector.broadcast %140 : vector<1x256xf32> to vector<8x256xf32>
    %142 = arith.mulf %139, %141 : vector<8x256xf32>
    %c239_i32_41 = arith.constant 239 : i32
    %143 = tpu.dynamic_rotate %114 by %c239_i32_41 dim 1 : vector<8x256xf32>, i32 -> vector<8x256xf32>
    %144 = vector.extract_strided_slice %4 {offsets = [8, 0], sizes = [1, 256], strides = [1, 1]} : vector<9x256xf32> to vector<1x256xf32>
    %145 = vector.broadcast %144 : vector<1x256xf32> to vector<8x256xf32>
    %146 = arith.mulf %143, %145 : vector<8x256xf32>
    %147 = tpu.concatenate %118, %122, %126, %130, %114, %134, %138, %142, %146 in 0 : vector<8x256xf32>, vector<8x256xf32>, vector<8x256xf32>, vector<8x256xf32>, vector<8x256xf32>, vector<8x256xf32>, vector<8x256xf32>, vector<8x256xf32>, vector<8x256xf32> -> vector<72x256xf32>
    %c2 = arith.constant 2 : index
    %c0_42 = arith.constant 0 : index
    %c0_43 = arith.constant 0 : index
    %148 = vector.load %arg5[%c2, %c0_42, %c0_43] : memref<3x8x72xf32, #tpu.memory_space<vmem>>, vector<1x8x72xf32>
    %149 = vector.shape_cast %148 : vector<1x8x72xf32> to vector<8x72xf32>
    %cst_44 = arith.constant dense<0.000000e+00> : vector<8x256xf32>
    %150 = tpu.matmul %149, %147, %cst_44 {dimension_numbers = #tpu.dot_dimension_numbers<[1], [0], [0], [1], [0, 0, 1, 1], [], []>} : vector<8x72xf32>, vector<72x256xf32>, vector<8x256xf32> -> vector<8x256xf32>
    %151 = vector.extract_strided_slice %0 {offsets = [0, 6], sizes = [8, 1], strides = [1, 1]} : vector<8x8xf32> to vector<8x1xf32>
    %152 = vector.broadcast %151 : vector<8x1xf32> to vector<8x256xf32>
    %153 = arith.mulf %150, %152 : vector<8x256xf32>
    %154 = vector.extract_strided_slice %0 {offsets = [0, 7], sizes = [8, 1], strides = [1, 1]} : vector<8x8xf32> to vector<8x1xf32>
    %155 = vector.broadcast %154 : vector<8x1xf32> to vector<8x256xf32>
    %156 = arith.addf %153, %155 : vector<8x256xf32>
    %cst_45 = arith.constant 0.000000e+00 : f32
    %157 = vector.broadcast %cst_45 : f32 to vector<8x256xf32>
    %158 = arith.maximumf %156, %157 : vector<8x256xf32>
    %c17_i32_46 = arith.constant 17 : i32
    %159 = tpu.dynamic_rotate %158 by %c17_i32_46 dim 1 : vector<8x256xf32>, i32 -> vector<8x256xf32>
    %160 = vector.extract_strided_slice %4 {offsets = [0, 0], sizes = [1, 256], strides = [1, 1]} : vector<9x256xf32> to vector<1x256xf32>
    %161 = vector.broadcast %160 : vector<1x256xf32> to vector<8x256xf32>
    %162 = arith.mulf %159, %161 : vector<8x256xf32>
    %c16_i32_47 = arith.constant 16 : i32
    %163 = tpu.dynamic_rotate %158 by %c16_i32_47 dim 1 : vector<8x256xf32>, i32 -> vector<8x256xf32>
    %164 = vector.extract_strided_slice %4 {offsets = [1, 0], sizes = [1, 256], strides = [1, 1]} : vector<9x256xf32> to vector<1x256xf32>
    %165 = vector.broadcast %164 : vector<1x256xf32> to vector<8x256xf32>
    %166 = arith.mulf %163, %165 : vector<8x256xf32>
    %c15_i32_48 = arith.constant 15 : i32
    %167 = tpu.dynamic_rotate %158 by %c15_i32_48 dim 1 : vector<8x256xf32>, i32 -> vector<8x256xf32>
    %168 = vector.extract_strided_slice %4 {offsets = [2, 0], sizes = [1, 256], strides = [1, 1]} : vector<9x256xf32> to vector<1x256xf32>
    %169 = vector.broadcast %168 : vector<1x256xf32> to vector<8x256xf32>
    %170 = arith.mulf %167, %169 : vector<8x256xf32>
    %c1_i32_49 = arith.constant 1 : i32
    %171 = tpu.dynamic_rotate %158 by %c1_i32_49 dim 1 : vector<8x256xf32>, i32 -> vector<8x256xf32>
    %172 = vector.extract_strided_slice %4 {offsets = [3, 0], sizes = [1, 256], strides = [1, 1]} : vector<9x256xf32> to vector<1x256xf32>
    %173 = vector.broadcast %172 : vector<1x256xf32> to vector<8x256xf32>
    %174 = arith.mulf %171, %173 : vector<8x256xf32>
    %c255_i32_50 = arith.constant 255 : i32
    %175 = tpu.dynamic_rotate %158 by %c255_i32_50 dim 1 : vector<8x256xf32>, i32 -> vector<8x256xf32>
    %176 = vector.extract_strided_slice %4 {offsets = [5, 0], sizes = [1, 256], strides = [1, 1]} : vector<9x256xf32> to vector<1x256xf32>
    %177 = vector.broadcast %176 : vector<1x256xf32> to vector<8x256xf32>
    %178 = arith.mulf %175, %177 : vector<8x256xf32>
    %c241_i32_51 = arith.constant 241 : i32
    %179 = tpu.dynamic_rotate %158 by %c241_i32_51 dim 1 : vector<8x256xf32>, i32 -> vector<8x256xf32>
    %180 = vector.extract_strided_slice %4 {offsets = [6, 0], sizes = [1, 256], strides = [1, 1]} : vector<9x256xf32> to vector<1x256xf32>
    %181 = vector.broadcast %180 : vector<1x256xf32> to vector<8x256xf32>
    %182 = arith.mulf %179, %181 : vector<8x256xf32>
    %c240_i32_52 = arith.constant 240 : i32
    %183 = tpu.dynamic_rotate %158 by %c240_i32_52 dim 1 : vector<8x256xf32>, i32 -> vector<8x256xf32>
    %184 = vector.extract_strided_slice %4 {offsets = [7, 0], sizes = [1, 256], strides = [1, 1]} : vector<9x256xf32> to vector<1x256xf32>
    %185 = vector.broadcast %184 : vector<1x256xf32> to vector<8x256xf32>
    %186 = arith.mulf %183, %185 : vector<8x256xf32>
    %c239_i32_53 = arith.constant 239 : i32
    %187 = tpu.dynamic_rotate %158 by %c239_i32_53 dim 1 : vector<8x256xf32>, i32 -> vector<8x256xf32>
    %188 = vector.extract_strided_slice %4 {offsets = [8, 0], sizes = [1, 256], strides = [1, 1]} : vector<9x256xf32> to vector<1x256xf32>
    %189 = vector.broadcast %188 : vector<1x256xf32> to vector<8x256xf32>
    %190 = arith.mulf %187, %189 : vector<8x256xf32>
    %191 = vector.extract_strided_slice %2 {offsets = [0, 0], sizes = [8, 1], strides = [1, 1]} : vector<8x9xf32> to vector<8x1xf32>
    %192 = vector.broadcast %191 : vector<8x1xf32> to vector<8x256xf32>
    %193 = arith.mulf %162, %192 : vector<8x256xf32>
    %194 = vector.extract_strided_slice %2 {offsets = [0, 1], sizes = [8, 1], strides = [1, 1]} : vector<8x9xf32> to vector<8x1xf32>
    %195 = vector.broadcast %194 : vector<8x1xf32> to vector<8x256xf32>
    %196 = arith.mulf %166, %195 : vector<8x256xf32>
    %197 = arith.addf %193, %196 : vector<8x256xf32>
    %198 = vector.extract_strided_slice %2 {offsets = [0, 2], sizes = [8, 1], strides = [1, 1]} : vector<8x9xf32> to vector<8x1xf32>
    %199 = vector.broadcast %198 : vector<8x1xf32> to vector<8x256xf32>
    %200 = arith.mulf %170, %199 : vector<8x256xf32>
    %201 = arith.addf %197, %200 : vector<8x256xf32>
    %202 = vector.extract_strided_slice %2 {offsets = [0, 3], sizes = [8, 1], strides = [1, 1]} : vector<8x9xf32> to vector<8x1xf32>
    %203 = vector.broadcast %202 : vector<8x1xf32> to vector<8x256xf32>
    %204 = arith.mulf %174, %203 : vector<8x256xf32>
    %205 = arith.addf %201, %204 : vector<8x256xf32>
    %206 = vector.extract_strided_slice %2 {offsets = [0, 4], sizes = [8, 1], strides = [1, 1]} : vector<8x9xf32> to vector<8x1xf32>
    %207 = vector.broadcast %206 : vector<8x1xf32> to vector<8x256xf32>
    %208 = arith.mulf %158, %207 : vector<8x256xf32>
    %209 = arith.addf %205, %208 : vector<8x256xf32>
    %210 = vector.extract_strided_slice %2 {offsets = [0, 5], sizes = [8, 1], strides = [1, 1]} : vector<8x9xf32> to vector<8x1xf32>
    %211 = vector.broadcast %210 : vector<8x1xf32> to vector<8x256xf32>
    %212 = arith.mulf %178, %211 : vector<8x256xf32>
    %213 = arith.addf %209, %212 : vector<8x256xf32>
    %214 = vector.extract_strided_slice %2 {offsets = [0, 6], sizes = [8, 1], strides = [1, 1]} : vector<8x9xf32> to vector<8x1xf32>
    %215 = vector.broadcast %214 : vector<8x1xf32> to vector<8x256xf32>
    %216 = arith.mulf %182, %215 : vector<8x256xf32>
    %217 = arith.addf %213, %216 : vector<8x256xf32>
    %218 = vector.extract_strided_slice %2 {offsets = [0, 7], sizes = [8, 1], strides = [1, 1]} : vector<8x9xf32> to vector<8x1xf32>
    %219 = vector.broadcast %218 : vector<8x1xf32> to vector<8x256xf32>
    %220 = arith.mulf %186, %219 : vector<8x256xf32>
    %221 = arith.addf %217, %220 : vector<8x256xf32>
    %222 = vector.extract_strided_slice %2 {offsets = [0, 8], sizes = [8, 1], strides = [1, 1]} : vector<8x9xf32> to vector<8x1xf32>
    %223 = vector.broadcast %222 : vector<8x1xf32> to vector<8x256xf32>
    %224 = arith.mulf %190, %223 : vector<8x256xf32>
    %225 = arith.addf %221, %224 : vector<8x256xf32>
    %cst_54 = arith.constant dense<0.000000e+00> : vector<256xf32>
    %226 = vector.multi_reduction <add>, %225, %cst_54 [0] : vector<8x256xf32> to vector<256xf32>
    %227 = vector.shape_cast %226 : vector<256xf32> to vector<1x256xf32>
    %228 = vector.broadcast %3 : vector<1x1xf32> to vector<1x256xf32>
    %229 = arith.addf %227, %228 : vector<1x256xf32>
    %230 = arith.addf %229, %8 : vector<1x256xf32>
    %c1_55 = arith.constant 1 : index
    %c0_56 = arith.constant 0 : index
    %c0_57 = arith.constant 0 : index
    %231 = vector.load %arg1[%c1_55, %c0_56, %c0_57] : memref<2x4x256xf32, #tpu.memory_space<vmem>>, vector<1x4x256xf32>
    %232 = vector.shape_cast %231 : vector<1x4x256xf32> to vector<4x256xf32>
    %233 = vector.extract_strided_slice %5 {offsets = [1, 0], sizes = [1, 256], strides = [1, 1]} : vector<2x256xf32> to vector<1x256xf32>
    %cst_58 = arith.constant dense<0.000000e+00> : vector<8x256xf32>
    %234 = tpu.matmul %1, %232, %cst_58 {dimension_numbers = #tpu.dot_dimension_numbers<[1], [0], [0], [1], [0, 0, 1, 1], [], []>} : vector<8x4xf32>, vector<4x256xf32>, vector<8x256xf32> -> vector<8x256xf32>
    %235 = vector.extract_strided_slice %0 {offsets = [0, 0], sizes = [8, 1], strides = [1, 1]} : vector<8x8xf32> to vector<8x1xf32>
    %236 = vector.broadcast %235 : vector<8x1xf32> to vector<8x256xf32>
    %237 = arith.mulf %234, %236 : vector<8x256xf32>
    %238 = vector.extract_strided_slice %0 {offsets = [0, 1], sizes = [8, 1], strides = [1, 1]} : vector<8x8xf32> to vector<8x1xf32>
    %239 = vector.broadcast %238 : vector<8x1xf32> to vector<8x256xf32>
    %240 = arith.addf %237, %239 : vector<8x256xf32>
    %cst_59 = arith.constant 0.000000e+00 : f32
    %241 = vector.broadcast %cst_59 : f32 to vector<8x256xf32>
    %242 = arith.maximumf %240, %241 : vector<8x256xf32>
    %cst_60 = arith.constant 0.000000e+00 : f32
    %243 = vector.broadcast %cst_60 : f32 to vector<1x256xf32>
    %244 = arith.subf %243, %233 : vector<1x256xf32>
    %245 = arith.negf %244 : vector<1x256xf32>
    %246 = math.exp %245 : vector<1x256xf32>
    %cst_61 = arith.constant 1.000000e+00 : f32
    %247 = vector.broadcast %cst_61 : f32 to vector<1x256xf32>
    %248 = arith.addf %247, %246 : vector<1x256xf32>
    %249 = arith.divf %247, %248 : vector<1x256xf32>
    %250 = vector.broadcast %249 : vector<1x256xf32> to vector<8x256xf32>
    %251 = arith.mulf %250, %242 : vector<8x256xf32>
    %c17_i32_62 = arith.constant 17 : i32
    %252 = tpu.dynamic_rotate %251 by %c17_i32_62 dim 1 : vector<8x256xf32>, i32 -> vector<8x256xf32>
    %253 = vector.extract_strided_slice %4 {offsets = [0, 0], sizes = [1, 256], strides = [1, 1]} : vector<9x256xf32> to vector<1x256xf32>
    %254 = vector.broadcast %253 : vector<1x256xf32> to vector<8x256xf32>
    %255 = arith.mulf %252, %254 : vector<8x256xf32>
    %c16_i32_63 = arith.constant 16 : i32
    %256 = tpu.dynamic_rotate %251 by %c16_i32_63 dim 1 : vector<8x256xf32>, i32 -> vector<8x256xf32>
    %257 = vector.extract_strided_slice %4 {offsets = [1, 0], sizes = [1, 256], strides = [1, 1]} : vector<9x256xf32> to vector<1x256xf32>
    %258 = vector.broadcast %257 : vector<1x256xf32> to vector<8x256xf32>
    %259 = arith.mulf %256, %258 : vector<8x256xf32>
    %c15_i32_64 = arith.constant 15 : i32
    %260 = tpu.dynamic_rotate %251 by %c15_i32_64 dim 1 : vector<8x256xf32>, i32 -> vector<8x256xf32>
    %261 = vector.extract_strided_slice %4 {offsets = [2, 0], sizes = [1, 256], strides = [1, 1]} : vector<9x256xf32> to vector<1x256xf32>
    %262 = vector.broadcast %261 : vector<1x256xf32> to vector<8x256xf32>
    %263 = arith.mulf %260, %262 : vector<8x256xf32>
    %c1_i32_65 = arith.constant 1 : i32
    %264 = tpu.dynamic_rotate %251 by %c1_i32_65 dim 1 : vector<8x256xf32>, i32 -> vector<8x256xf32>
    %265 = vector.extract_strided_slice %4 {offsets = [3, 0], sizes = [1, 256], strides = [1, 1]} : vector<9x256xf32> to vector<1x256xf32>
    %266 = vector.broadcast %265 : vector<1x256xf32> to vector<8x256xf32>
    %267 = arith.mulf %264, %266 : vector<8x256xf32>
    %c255_i32_66 = arith.constant 255 : i32
    %268 = tpu.dynamic_rotate %251 by %c255_i32_66 dim 1 : vector<8x256xf32>, i32 -> vector<8x256xf32>
    %269 = vector.extract_strided_slice %4 {offsets = [5, 0], sizes = [1, 256], strides = [1, 1]} : vector<9x256xf32> to vector<1x256xf32>
    %270 = vector.broadcast %269 : vector<1x256xf32> to vector<8x256xf32>
    %271 = arith.mulf %268, %270 : vector<8x256xf32>
    %c241_i32_67 = arith.constant 241 : i32
    %272 = tpu.dynamic_rotate %251 by %c241_i32_67 dim 1 : vector<8x256xf32>, i32 -> vector<8x256xf32>
    %273 = vector.extract_strided_slice %4 {offsets = [6, 0], sizes = [1, 256], strides = [1, 1]} : vector<9x256xf32> to vector<1x256xf32>
    %274 = vector.broadcast %273 : vector<1x256xf32> to vector<8x256xf32>
    %275 = arith.mulf %272, %274 : vector<8x256xf32>
    %c240_i32_68 = arith.constant 240 : i32
    %276 = tpu.dynamic_rotate %251 by %c240_i32_68 dim 1 : vector<8x256xf32>, i32 -> vector<8x256xf32>
    %277 = vector.extract_strided_slice %4 {offsets = [7, 0], sizes = [1, 256], strides = [1, 1]} : vector<9x256xf32> to vector<1x256xf32>
    %278 = vector.broadcast %277 : vector<1x256xf32> to vector<8x256xf32>
    %279 = arith.mulf %276, %278 : vector<8x256xf32>
    %c239_i32_69 = arith.constant 239 : i32
    %280 = tpu.dynamic_rotate %251 by %c239_i32_69 dim 1 : vector<8x256xf32>, i32 -> vector<8x256xf32>
    %281 = vector.extract_strided_slice %4 {offsets = [8, 0], sizes = [1, 256], strides = [1, 1]} : vector<9x256xf32> to vector<1x256xf32>
    %282 = vector.broadcast %281 : vector<1x256xf32> to vector<8x256xf32>
    %283 = arith.mulf %280, %282 : vector<8x256xf32>
    %284 = tpu.concatenate %255, %259, %263, %267, %251, %271, %275, %279, %283 in 0 : vector<8x256xf32>, vector<8x256xf32>, vector<8x256xf32>, vector<8x256xf32>, vector<8x256xf32>, vector<8x256xf32>, vector<8x256xf32>, vector<8x256xf32>, vector<8x256xf32> -> vector<72x256xf32>
    %c0_70 = arith.constant 0 : index
    %c0_71 = arith.constant 0 : index
    %c0_72 = arith.constant 0 : index
    %285 = vector.load %arg5[%c0_70, %c0_71, %c0_72] : memref<3x8x72xf32, #tpu.memory_space<vmem>>, vector<1x8x72xf32>
    %286 = vector.shape_cast %285 : vector<1x8x72xf32> to vector<8x72xf32>
    %cst_73 = arith.constant dense<0.000000e+00> : vector<8x256xf32>
    %287 = tpu.matmul %286, %284, %cst_73 {dimension_numbers = #tpu.dot_dimension_numbers<[1], [0], [0], [1], [0, 0, 1, 1], [], []>} : vector<8x72xf32>, vector<72x256xf32>, vector<8x256xf32> -> vector<8x256xf32>
    %288 = vector.extract_strided_slice %0 {offsets = [0, 2], sizes = [8, 1], strides = [1, 1]} : vector<8x8xf32> to vector<8x1xf32>
    %289 = vector.broadcast %288 : vector<8x1xf32> to vector<8x256xf32>
    %290 = arith.mulf %287, %289 : vector<8x256xf32>
    %291 = vector.extract_strided_slice %0 {offsets = [0, 3], sizes = [8, 1], strides = [1, 1]} : vector<8x8xf32> to vector<8x1xf32>
    %292 = vector.broadcast %291 : vector<8x1xf32> to vector<8x256xf32>
    %293 = arith.addf %290, %292 : vector<8x256xf32>
    %cst_74 = arith.constant 0.000000e+00 : f32
    %294 = vector.broadcast %cst_74 : f32 to vector<8x256xf32>
    %295 = arith.maximumf %293, %294 : vector<8x256xf32>
    %c17_i32_75 = arith.constant 17 : i32
    %296 = tpu.dynamic_rotate %295 by %c17_i32_75 dim 1 : vector<8x256xf32>, i32 -> vector<8x256xf32>
    %297 = vector.extract_strided_slice %4 {offsets = [0, 0], sizes = [1, 256], strides = [1, 1]} : vector<9x256xf32> to vector<1x256xf32>
    %298 = vector.broadcast %297 : vector<1x256xf32> to vector<8x256xf32>
    %299 = arith.mulf %296, %298 : vector<8x256xf32>
    %c16_i32_76 = arith.constant 16 : i32
    %300 = tpu.dynamic_rotate %295 by %c16_i32_76 dim 1 : vector<8x256xf32>, i32 -> vector<8x256xf32>
    %301 = vector.extract_strided_slice %4 {offsets = [1, 0], sizes = [1, 256], strides = [1, 1]} : vector<9x256xf32> to vector<1x256xf32>
    %302 = vector.broadcast %301 : vector<1x256xf32> to vector<8x256xf32>
    %303 = arith.mulf %300, %302 : vector<8x256xf32>
    %c15_i32_77 = arith.constant 15 : i32
    %304 = tpu.dynamic_rotate %295 by %c15_i32_77 dim 1 : vector<8x256xf32>, i32 -> vector<8x256xf32>
    %305 = vector.extract_strided_slice %4 {offsets = [2, 0], sizes = [1, 256], strides = [1, 1]} : vector<9x256xf32> to vector<1x256xf32>
    %306 = vector.broadcast %305 : vector<1x256xf32> to vector<8x256xf32>
    %307 = arith.mulf %304, %306 : vector<8x256xf32>
    %c1_i32_78 = arith.constant 1 : i32
    %308 = tpu.dynamic_rotate %295 by %c1_i32_78 dim 1 : vector<8x256xf32>, i32 -> vector<8x256xf32>
    %309 = vector.extract_strided_slice %4 {offsets = [3, 0], sizes = [1, 256], strides = [1, 1]} : vector<9x256xf32> to vector<1x256xf32>
    %310 = vector.broadcast %309 : vector<1x256xf32> to vector<8x256xf32>
    %311 = arith.mulf %308, %310 : vector<8x256xf32>
    %c255_i32_79 = arith.constant 255 : i32
    %312 = tpu.dynamic_rotate %295 by %c255_i32_79 dim 1 : vector<8x256xf32>, i32 -> vector<8x256xf32>
    %313 = vector.extract_strided_slice %4 {offsets = [5, 0], sizes = [1, 256], strides = [1, 1]} : vector<9x256xf32> to vector<1x256xf32>
    %314 = vector.broadcast %313 : vector<1x256xf32> to vector<8x256xf32>
    %315 = arith.mulf %312, %314 : vector<8x256xf32>
    %c241_i32_80 = arith.constant 241 : i32
    %316 = tpu.dynamic_rotate %295 by %c241_i32_80 dim 1 : vector<8x256xf32>, i32 -> vector<8x256xf32>
    %317 = vector.extract_strided_slice %4 {offsets = [6, 0], sizes = [1, 256], strides = [1, 1]} : vector<9x256xf32> to vector<1x256xf32>
    %318 = vector.broadcast %317 : vector<1x256xf32> to vector<8x256xf32>
    %319 = arith.mulf %316, %318 : vector<8x256xf32>
    %c240_i32_81 = arith.constant 240 : i32
    %320 = tpu.dynamic_rotate %295 by %c240_i32_81 dim 1 : vector<8x256xf32>, i32 -> vector<8x256xf32>
    %321 = vector.extract_strided_slice %4 {offsets = [7, 0], sizes = [1, 256], strides = [1, 1]} : vector<9x256xf32> to vector<1x256xf32>
    %322 = vector.broadcast %321 : vector<1x256xf32> to vector<8x256xf32>
    %323 = arith.mulf %320, %322 : vector<8x256xf32>
    %c239_i32_82 = arith.constant 239 : i32
    %324 = tpu.dynamic_rotate %295 by %c239_i32_82 dim 1 : vector<8x256xf32>, i32 -> vector<8x256xf32>
    %325 = vector.extract_strided_slice %4 {offsets = [8, 0], sizes = [1, 256], strides = [1, 1]} : vector<9x256xf32> to vector<1x256xf32>
    %326 = vector.broadcast %325 : vector<1x256xf32> to vector<8x256xf32>
    %327 = arith.mulf %324, %326 : vector<8x256xf32>
    %328 = tpu.concatenate %299, %303, %307, %311, %295, %315, %319, %323, %327 in 0 : vector<8x256xf32>, vector<8x256xf32>, vector<8x256xf32>, vector<8x256xf32>, vector<8x256xf32>, vector<8x256xf32>, vector<8x256xf32>, vector<8x256xf32>, vector<8x256xf32> -> vector<72x256xf32>
    %c1_83 = arith.constant 1 : index
    %c0_84 = arith.constant 0 : index
    %c0_85 = arith.constant 0 : index
    %329 = vector.load %arg5[%c1_83, %c0_84, %c0_85] : memref<3x8x72xf32, #tpu.memory_space<vmem>>, vector<1x8x72xf32>
    %330 = vector.shape_cast %329 : vector<1x8x72xf32> to vector<8x72xf32>
    %cst_86 = arith.constant dense<0.000000e+00> : vector<8x256xf32>
    %331 = tpu.matmul %330, %328, %cst_86 {dimension_numbers = #tpu.dot_dimension_numbers<[1], [0], [0], [1], [0, 0, 1, 1], [], []>} : vector<8x72xf32>, vector<72x256xf32>, vector<8x256xf32> -> vector<8x256xf32>
    %332 = vector.extract_strided_slice %0 {offsets = [0, 4], sizes = [8, 1], strides = [1, 1]} : vector<8x8xf32> to vector<8x1xf32>
    %333 = vector.broadcast %332 : vector<8x1xf32> to vector<8x256xf32>
    %334 = arith.mulf %331, %333 : vector<8x256xf32>
    %335 = vector.extract_strided_slice %0 {offsets = [0, 5], sizes = [8, 1], strides = [1, 1]} : vector<8x8xf32> to vector<8x1xf32>
    %336 = vector.broadcast %335 : vector<8x1xf32> to vector<8x256xf32>
    %337 = arith.addf %334, %336 : vector<8x256xf32>
    %cst_87 = arith.constant 0.000000e+00 : f32
    %338 = vector.broadcast %cst_87 : f32 to vector<8x256xf32>
    %339 = arith.maximumf %337, %338 : vector<8x256xf32>
    %c17_i32_88 = arith.constant 17 : i32
    %340 = tpu.dynamic_rotate %339 by %c17_i32_88 dim 1 : vector<8x256xf32>, i32 -> vector<8x256xf32>
    %341 = vector.extract_strided_slice %4 {offsets = [0, 0], sizes = [1, 256], strides = [1, 1]} : vector<9x256xf32> to vector<1x256xf32>
    %342 = vector.broadcast %341 : vector<1x256xf32> to vector<8x256xf32>
    %343 = arith.mulf %340, %342 : vector<8x256xf32>
    %c16_i32_89 = arith.constant 16 : i32
    %344 = tpu.dynamic_rotate %339 by %c16_i32_89 dim 1 : vector<8x256xf32>, i32 -> vector<8x256xf32>
    %345 = vector.extract_strided_slice %4 {offsets = [1, 0], sizes = [1, 256], strides = [1, 1]} : vector<9x256xf32> to vector<1x256xf32>
    %346 = vector.broadcast %345 : vector<1x256xf32> to vector<8x256xf32>
    %347 = arith.mulf %344, %346 : vector<8x256xf32>
    %c15_i32_90 = arith.constant 15 : i32
    %348 = tpu.dynamic_rotate %339 by %c15_i32_90 dim 1 : vector<8x256xf32>, i32 -> vector<8x256xf32>
    %349 = vector.extract_strided_slice %4 {offsets = [2, 0], sizes = [1, 256], strides = [1, 1]} : vector<9x256xf32> to vector<1x256xf32>
    %350 = vector.broadcast %349 : vector<1x256xf32> to vector<8x256xf32>
    %351 = arith.mulf %348, %350 : vector<8x256xf32>
    %c1_i32_91 = arith.constant 1 : i32
    %352 = tpu.dynamic_rotate %339 by %c1_i32_91 dim 1 : vector<8x256xf32>, i32 -> vector<8x256xf32>
    %353 = vector.extract_strided_slice %4 {offsets = [3, 0], sizes = [1, 256], strides = [1, 1]} : vector<9x256xf32> to vector<1x256xf32>
    %354 = vector.broadcast %353 : vector<1x256xf32> to vector<8x256xf32>
    %355 = arith.mulf %352, %354 : vector<8x256xf32>
    %c255_i32_92 = arith.constant 255 : i32
    %356 = tpu.dynamic_rotate %339 by %c255_i32_92 dim 1 : vector<8x256xf32>, i32 -> vector<8x256xf32>
    %357 = vector.extract_strided_slice %4 {offsets = [5, 0], sizes = [1, 256], strides = [1, 1]} : vector<9x256xf32> to vector<1x256xf32>
    %358 = vector.broadcast %357 : vector<1x256xf32> to vector<8x256xf32>
    %359 = arith.mulf %356, %358 : vector<8x256xf32>
    %c241_i32_93 = arith.constant 241 : i32
    %360 = tpu.dynamic_rotate %339 by %c241_i32_93 dim 1 : vector<8x256xf32>, i32 -> vector<8x256xf32>
    %361 = vector.extract_strided_slice %4 {offsets = [6, 0], sizes = [1, 256], strides = [1, 1]} : vector<9x256xf32> to vector<1x256xf32>
    %362 = vector.broadcast %361 : vector<1x256xf32> to vector<8x256xf32>
    %363 = arith.mulf %360, %362 : vector<8x256xf32>
    %c240_i32_94 = arith.constant 240 : i32
    %364 = tpu.dynamic_rotate %339 by %c240_i32_94 dim 1 : vector<8x256xf32>, i32 -> vector<8x256xf32>
    %365 = vector.extract_strided_slice %4 {offsets = [7, 0], sizes = [1, 256], strides = [1, 1]} : vector<9x256xf32> to vector<1x256xf32>
    %366 = vector.broadcast %365 : vector<1x256xf32> to vector<8x256xf32>
    %367 = arith.mulf %364, %366 : vector<8x256xf32>
    %c239_i32_95 = arith.constant 239 : i32
    %368 = tpu.dynamic_rotate %339 by %c239_i32_95 dim 1 : vector<8x256xf32>, i32 -> vector<8x256xf32>
    %369 = vector.extract_strided_slice %4 {offsets = [8, 0], sizes = [1, 256], strides = [1, 1]} : vector<9x256xf32> to vector<1x256xf32>
    %370 = vector.broadcast %369 : vector<1x256xf32> to vector<8x256xf32>
    %371 = arith.mulf %368, %370 : vector<8x256xf32>
    %372 = tpu.concatenate %343, %347, %351, %355, %339, %359, %363, %367, %371 in 0 : vector<8x256xf32>, vector<8x256xf32>, vector<8x256xf32>, vector<8x256xf32>, vector<8x256xf32>, vector<8x256xf32>, vector<8x256xf32>, vector<8x256xf32>, vector<8x256xf32> -> vector<72x256xf32>
    %c2_96 = arith.constant 2 : index
    %c0_97 = arith.constant 0 : index
    %c0_98 = arith.constant 0 : index
    %373 = vector.load %arg5[%c2_96, %c0_97, %c0_98] : memref<3x8x72xf32, #tpu.memory_space<vmem>>, vector<1x8x72xf32>
    %374 = vector.shape_cast %373 : vector<1x8x72xf32> to vector<8x72xf32>
    %cst_99 = arith.constant dense<0.000000e+00> : vector<8x256xf32>
    %375 = tpu.matmul %374, %372, %cst_99 {dimension_numbers = #tpu.dot_dimension_numbers<[1], [0], [0], [1], [0, 0, 1, 1], [], []>} : vector<8x72xf32>, vector<72x256xf32>, vector<8x256xf32> -> vector<8x256xf32>
    %376 = vector.extract_strided_slice %0 {offsets = [0, 6], sizes = [8, 1], strides = [1, 1]} : vector<8x8xf32> to vector<8x1xf32>
    %377 = vector.broadcast %376 : vector<8x1xf32> to vector<8x256xf32>
    %378 = arith.mulf %375, %377 : vector<8x256xf32>
    %379 = vector.extract_strided_slice %0 {offsets = [0, 7], sizes = [8, 1], strides = [1, 1]} : vector<8x8xf32> to vector<8x1xf32>
    %380 = vector.broadcast %379 : vector<8x1xf32> to vector<8x256xf32>
    %381 = arith.addf %378, %380 : vector<8x256xf32>
    %cst_100 = arith.constant 0.000000e+00 : f32
    %382 = vector.broadcast %cst_100 : f32 to vector<8x256xf32>
    %383 = arith.maximumf %381, %382 : vector<8x256xf32>
    %c17_i32_101 = arith.constant 17 : i32
    %384 = tpu.dynamic_rotate %383 by %c17_i32_101 dim 1 : vector<8x256xf32>, i32 -> vector<8x256xf32>
    %385 = vector.extract_strided_slice %4 {offsets = [0, 0], sizes = [1, 256], strides = [1, 1]} : vector<9x256xf32> to vector<1x256xf32>
    %386 = vector.broadcast %385 : vector<1x256xf32> to vector<8x256xf32>
    %387 = arith.mulf %384, %386 : vector<8x256xf32>
    %c16_i32_102 = arith.constant 16 : i32
    %388 = tpu.dynamic_rotate %383 by %c16_i32_102 dim 1 : vector<8x256xf32>, i32 -> vector<8x256xf32>
    %389 = vector.extract_strided_slice %4 {offsets = [1, 0], sizes = [1, 256], strides = [1, 1]} : vector<9x256xf32> to vector<1x256xf32>
    %390 = vector.broadcast %389 : vector<1x256xf32> to vector<8x256xf32>
    %391 = arith.mulf %388, %390 : vector<8x256xf32>
    %c15_i32_103 = arith.constant 15 : i32
    %392 = tpu.dynamic_rotate %383 by %c15_i32_103 dim 1 : vector<8x256xf32>, i32 -> vector<8x256xf32>
    %393 = vector.extract_strided_slice %4 {offsets = [2, 0], sizes = [1, 256], strides = [1, 1]} : vector<9x256xf32> to vector<1x256xf32>
    %394 = vector.broadcast %393 : vector<1x256xf32> to vector<8x256xf32>
    %395 = arith.mulf %392, %394 : vector<8x256xf32>
    %c1_i32_104 = arith.constant 1 : i32
    %396 = tpu.dynamic_rotate %383 by %c1_i32_104 dim 1 : vector<8x256xf32>, i32 -> vector<8x256xf32>
    %397 = vector.extract_strided_slice %4 {offsets = [3, 0], sizes = [1, 256], strides = [1, 1]} : vector<9x256xf32> to vector<1x256xf32>
    %398 = vector.broadcast %397 : vector<1x256xf32> to vector<8x256xf32>
    %399 = arith.mulf %396, %398 : vector<8x256xf32>
    %c255_i32_105 = arith.constant 255 : i32
    %400 = tpu.dynamic_rotate %383 by %c255_i32_105 dim 1 : vector<8x256xf32>, i32 -> vector<8x256xf32>
    %401 = vector.extract_strided_slice %4 {offsets = [5, 0], sizes = [1, 256], strides = [1, 1]} : vector<9x256xf32> to vector<1x256xf32>
    %402 = vector.broadcast %401 : vector<1x256xf32> to vector<8x256xf32>
    %403 = arith.mulf %400, %402 : vector<8x256xf32>
    %c241_i32_106 = arith.constant 241 : i32
    %404 = tpu.dynamic_rotate %383 by %c241_i32_106 dim 1 : vector<8x256xf32>, i32 -> vector<8x256xf32>
    %405 = vector.extract_strided_slice %4 {offsets = [6, 0], sizes = [1, 256], strides = [1, 1]} : vector<9x256xf32> to vector<1x256xf32>
    %406 = vector.broadcast %405 : vector<1x256xf32> to vector<8x256xf32>
    %407 = arith.mulf %404, %406 : vector<8x256xf32>
    %c240_i32_107 = arith.constant 240 : i32
    %408 = tpu.dynamic_rotate %383 by %c240_i32_107 dim 1 : vector<8x256xf32>, i32 -> vector<8x256xf32>
    %409 = vector.extract_strided_slice %4 {offsets = [7, 0], sizes = [1, 256], strides = [1, 1]} : vector<9x256xf32> to vector<1x256xf32>
    %410 = vector.broadcast %409 : vector<1x256xf32> to vector<8x256xf32>
    %411 = arith.mulf %408, %410 : vector<8x256xf32>
    %c239_i32_108 = arith.constant 239 : i32
    %412 = tpu.dynamic_rotate %383 by %c239_i32_108 dim 1 : vector<8x256xf32>, i32 -> vector<8x256xf32>
    %413 = vector.extract_strided_slice %4 {offsets = [8, 0], sizes = [1, 256], strides = [1, 1]} : vector<9x256xf32> to vector<1x256xf32>
    %414 = vector.broadcast %413 : vector<1x256xf32> to vector<8x256xf32>
    %415 = arith.mulf %412, %414 : vector<8x256xf32>
    %416 = vector.extract_strided_slice %2 {offsets = [0, 0], sizes = [8, 1], strides = [1, 1]} : vector<8x9xf32> to vector<8x1xf32>
    %417 = vector.broadcast %416 : vector<8x1xf32> to vector<8x256xf32>
    %418 = arith.mulf %387, %417 : vector<8x256xf32>
    %419 = vector.extract_strided_slice %2 {offsets = [0, 1], sizes = [8, 1], strides = [1, 1]} : vector<8x9xf32> to vector<8x1xf32>
    %420 = vector.broadcast %419 : vector<8x1xf32> to vector<8x256xf32>
    %421 = arith.mulf %391, %420 : vector<8x256xf32>
    %422 = arith.addf %418, %421 : vector<8x256xf32>
    %423 = vector.extract_strided_slice %2 {offsets = [0, 2], sizes = [8, 1], strides = [1, 1]} : vector<8x9xf32> to vector<8x1xf32>
    %424 = vector.broadcast %423 : vector<8x1xf32> to vector<8x256xf32>
    %425 = arith.mulf %395, %424 : vector<8x256xf32>
    %426 = arith.addf %422, %425 : vector<8x256xf32>
    %427 = vector.extract_strided_slice %2 {offsets = [0, 3], sizes = [8, 1], strides = [1, 1]} : vector<8x9xf32> to vector<8x1xf32>
    %428 = vector.broadcast %427 : vector<8x1xf32> to vector<8x256xf32>
    %429 = arith.mulf %399, %428 : vector<8x256xf32>
    %430 = arith.addf %426, %429 : vector<8x256xf32>
    %431 = vector.extract_strided_slice %2 {offsets = [0, 4], sizes = [8, 1], strides = [1, 1]} : vector<8x9xf32> to vector<8x1xf32>
    %432 = vector.broadcast %431 : vector<8x1xf32> to vector<8x256xf32>
    %433 = arith.mulf %383, %432 : vector<8x256xf32>
    %434 = arith.addf %430, %433 : vector<8x256xf32>
    %435 = vector.extract_strided_slice %2 {offsets = [0, 5], sizes = [8, 1], strides = [1, 1]} : vector<8x9xf32> to vector<8x1xf32>
    %436 = vector.broadcast %435 : vector<8x1xf32> to vector<8x256xf32>
    %437 = arith.mulf %403, %436 : vector<8x256xf32>
    %438 = arith.addf %434, %437 : vector<8x256xf32>
    %439 = vector.extract_strided_slice %2 {offsets = [0, 6], sizes = [8, 1], strides = [1, 1]} : vector<8x9xf32> to vector<8x1xf32>
    %440 = vector.broadcast %439 : vector<8x1xf32> to vector<8x256xf32>
    %441 = arith.mulf %407, %440 : vector<8x256xf32>
    %442 = arith.addf %438, %441 : vector<8x256xf32>
    %443 = vector.extract_strided_slice %2 {offsets = [0, 7], sizes = [8, 1], strides = [1, 1]} : vector<8x9xf32> to vector<8x1xf32>
    %444 = vector.broadcast %443 : vector<8x1xf32> to vector<8x256xf32>
    %445 = arith.mulf %411, %444 : vector<8x256xf32>
    %446 = arith.addf %442, %445 : vector<8x256xf32>
    %447 = vector.extract_strided_slice %2 {offsets = [0, 8], sizes = [8, 1], strides = [1, 1]} : vector<8x9xf32> to vector<8x1xf32>
    %448 = vector.broadcast %447 : vector<8x1xf32> to vector<8x256xf32>
    %449 = arith.mulf %415, %448 : vector<8x256xf32>
    %450 = arith.addf %446, %449 : vector<8x256xf32>
    %cst_109 = arith.constant dense<0.000000e+00> : vector<256xf32>
    %451 = vector.multi_reduction <add>, %450, %cst_109 [0] : vector<8x256xf32> to vector<256xf32>
    %452 = vector.shape_cast %451 : vector<256xf32> to vector<1x256xf32>
    %453 = vector.broadcast %3 : vector<1x1xf32> to vector<1x256xf32>
    %454 = arith.addf %452, %453 : vector<1x256xf32>
    %455 = arith.addf %454, %233 : vector<1x256xf32>
    %456 = tpu.concatenate %230, %455 in 0 : vector<1x256xf32>, vector<1x256xf32> -> vector<2x256xf32>
    %c0_110 = arith.constant 0 : index
    %c0_111 = arith.constant 0 : index
    %457 = vector.load %arg9[%c0_110, %c0_111] : memref<2x256xf32, #tpu.memory_space<vmem>>, vector<2x256xf32>
    tpu.vector_store %arg9[%c0_110, %c0_111], %456 {strides = array<i32>} : memref<2x256xf32, #tpu.memory_space<vmem>>, vector<2x256xf32>,
    return
  }
  func.func @transform_0(%arg0: i32) -> (i32, i32, i32) {
    %c0_i32 = arith.constant 0 : i32
    %c0_i32_0 = arith.constant 0 : i32
    %c0_i32_1 = arith.constant 0 : i32
    return %arg0, %c0_i32, %c0_i32_0 : i32, i32, i32
  }
  func.func @transform_1(%arg0: i32) -> (i32, i32) {
    %c0_i32 = arith.constant 0 : i32
    %c0_i32_0 = arith.constant 0 : i32
    return %arg0, %c0_i32 : i32, i32
  }
  func.func @transform_2(%arg0: i32) -> (i32, i32) {
    %c0_i32 = arith.constant 0 : i32
    %c0_i32_0 = arith.constant 0 : i32
    %c0_i32_1 = arith.constant 0 : i32
    return %c0_i32, %c0_i32_0 : i32, i32
  }
  func.func @transform_3(%arg0: i32) -> (i32, i32) {
    %c0_i32 = arith.constant 0 : i32
    %c0_i32_0 = arith.constant 0 : i32
    %c0_i32_1 = arith.constant 0 : i32
    return %c0_i32, %c0_i32_0 : i32, i32
  }
  func.func @transform_4(%arg0: i32) -> (i32, i32, i32) {
    %c0_i32 = arith.constant 0 : i32
    %c0_i32_0 = arith.constant 0 : i32
    %c0_i32_1 = arith.constant 0 : i32
    %c0_i32_2 = arith.constant 0 : i32
    return %c0_i32, %c0_i32_0, %c0_i32_1 : i32, i32, i32
  }
  func.func @transform_5(%arg0: i32) -> (i32, i32) {
    %c0_i32 = arith.constant 0 : i32
    %c0_i32_0 = arith.constant 0 : i32
    %c0_i32_1 = arith.constant 0 : i32
    return %c0_i32, %c0_i32_0 : i32, i32
  }
  func.func @transform_6(%arg0: i32) -> (i32, i32) {
    %c0_i32 = arith.constant 0 : i32
    %c0_i32_0 = arith.constant 0 : i32
    %c0_i32_1 = arith.constant 0 : i32
    return %c0_i32, %c0_i32_0 : i32, i32
  }
  func.func @transform_7(%arg0: i32) -> (i32, i32) {
    %c0_i32 = arith.constant 0 : i32
    %c0_i32_0 = arith.constant 0 : i32
    %c0_i32_1 = arith.constant 0 : i32
    return %c0_i32, %c0_i32_0 : i32, i32
  }
  func.func @transform_8(%arg0: i32) -> (i32, i32) {
    %c0_i32 = arith.constant 0 : i32
    %c0_i32_0 = arith.constant 0 : i32
    return %arg0, %c0_i32 : i32, i32
  }
}

</mosaic_0001>

<bundles_post_ra>
// kernel: tpu_custom_call.1
= control target key start
LH: loop header
LB: loop body
LE: loop exit
PB: predicated region body
PF: predicated region fallthrough
CT: control target
= control target key end

     0   :  { %s2991_s0 = inlined_call_operand.hbm [shape: f32[2,4,256], index: 0, kind: input, shape index: {}]   ;;  %s2992_s1 = inlined_call_operand.vmem [shape: f32[2,256], index: 1, kind: input, shape index: {}]   ;;  %s2993_s2 = inlined_call_operand.vmem [shape: f32[8,4], index: 2, kind: input, shape index: {}]   ;;  %s2994_s3 = inlined_call_operand.hbm [shape: f32[8,8], index: 3, kind: input, shape index: {}]   ;;  %s2995_s4 = inlined_call_operand.hbm [shape: f32[3,8,72], index: 4, kind: input, shape index: {}]   ;;  %s2996_s5 = inlined_call_operand.hbm [shape: f32[8,9], index: 5, kind: input, shape index: {}]   ;;  %s2997_s6 = inlined_call_operand.<no memory space> [shape: f32[1,1], index: 6, kind: input, shape index: {}]   ;;  %s2998_s7 = inlined_call_operand.vmem [shape: f32[9,256], index: 7, kind: input, shape index: {}]   ;;  %s2999_s8 = inlined_call_operand.hbm [shape: f32[2,256], index: 8, kind: output, shape index: {}]  }
   0x1   :  { %v13_v0 = vstv %s2997_s6 }
   0x2   :  { %14 = vst [vmem:[#allocation2] sm:$0x1] %v13_v0 }
   0x3   :  { %15 = vsyncpa [#allocation4], 0 }
   0x4   :  { %16 = vsyncpa [#allocation7], 0 }
   0x5   :  { %17 = vsyncpa [#allocation10], 0 }
   0x6   :  { %18 = vsyncpa [#allocation5], 0  ;;  %s1898_s29 = smov [#allocation6]   ;;  %s1899_s9 = smov [#allocation3]  }
   0x7   :  { %s41_s30 = sshll.u32 %s1898_s29, 4  ;;  %s24_s10 = sshll.u32 %s1899_s9, 4  ;;  %s42_s30 = int_to_ptr.vmem [resolvable:$true] %s41_s30  ;;  %s1971_s10 = int_to_ptr.vmem [resolvable:$true] %s24_s10 }
   0x8   :  { %s1780_s13 = scalar_lea.hbm %s2994_s3, 128 }
   0x9   :  { %p1781_p0 = scmp.ne.s32.totalorder %s2994_s3, %s1780_s13  ;;  %p1784_p1 = scmp.lt.u32.totalorder %s1780_s13, %s2994_s3 }
   0xb   :  { %p1786_p2 = pnand %p1784_p1, %p1781_p0 }
   0xd   :  { %1789 = shalt.err (!%p1786_p2)
}
   0xe   :  { %s1790_s17 = scalar_lea.vmem %s42_s30, 128  ;;  %p1795_p4 = scmp.lt.s32.totalorder %s42_s30, %s42_s30 }
   0xf   :  { %p1791_p3 = scmp.ne.s32.totalorder %s42_s30, %s1790_s17  ;;  %p1796_p5 = scmp.lt.s32.totalorder %s1790_s17, %s1790_s17 }
  0x11   :  { %p1797_p6 = por %p1796_p5, %p1795_p4 }
  0x13   :  { %p1798_p7 = pnand %p1797_p6, %p1791_p3 }
  0x15   :  { %1801 = shalt.err (!%p1798_p7)
}
  0x16   :  { %44 = dma.hbm_to_vmem [thread:$0]  %s2994_s3, 128, %s42_s30, [#allocation7]  }
  0x17   :  { %s1802_s22 = scalar_lea.hbm %s2991_s0, 256 }
  0x18   :  { %p1803_p8 = scmp.ne.s32.totalorder %s2991_s0, %s1802_s22  ;;  %p1806_p9 = scmp.lt.u32.totalorder %s1802_s22, %s2991_s0 }
  0x1a   :  { %p1808_p10 = pnand %p1806_p9, %p1803_p8 }
  0x1c   :  { %1811 = shalt.err (!%p1808_p10)
}
  0x1d   :  { %s1812_s27 = scalar_lea.vmem %s1971_s10, 256  ;;  %p1817_p12 = scmp.lt.s32.totalorder %s1971_s10, %s1971_s10 }
  0x1e   :  { %p1813_p11 = scmp.ne.s32.totalorder %s1971_s10, %s1812_s27  ;;  %p1818_p13 = scmp.lt.s32.totalorder %s1812_s27, %s1812_s27 }
  0x20   :  { %p1819_p0 = por %p1818_p13, %p1817_p12 }
  0x22   :  { %p1820_p1 = pnand %p1819_p0, %p1813_p11 }
  0x24   :  { %1823 = shalt.err (!%p1820_p1)
}
  0x25   :  { %s1900_s3 = smov 128   ;;  %s1901_s28 = smov 8  }
  0x26   :  { %30 = dma.hbm_to_vmem [thread:$0]  %s2991_s0, 256, %s1971_s10, [#allocation4], %s1900_s3, %s1900_s3, %s1901_s28  }
  0x27   :  { %s1902_s9 = smov [#allocation8]   ;;  %s1903_s12 = smov [#allocation9]  }
  0x28   :  { %s50_s11 = sshll.u32 %s1902_s9, 4  ;;  %s63_s13 = sshll.u32 %s1903_s12, 4  ;;  %s51_s11 = int_to_ptr.vmem [resolvable:$true] %s50_s11  ;;  %s64_s13 = int_to_ptr.vmem [resolvable:$true] %s63_s13 }
  0x29   :  { %s1824_s6 = scalar_lea.hbm %s2995_s4, 384 }
  0x2a   :  { %p1825_p2 = scmp.ne.s32.totalorder %s2995_s4, %s1824_s6  ;;  %p1828_p3 = scmp.lt.u32.totalorder %s1824_s6, %s2995_s4 }
  0x2c   :  { %p1830_p4 = pnand %p1828_p3, %p1825_p2 }
  0x2e   :  { %1833 = shalt.err (!%p1830_p4)
}
  0x2f   :  { %s1834_s0 = scalar_lea.vmem %s51_s11, 384  ;;  %p1839_p6 = scmp.lt.s32.totalorder %s51_s11, %s51_s11 }
  0x30   :  { %p1835_p5 = scmp.ne.s32.totalorder %s51_s11, %s1834_s0  ;;  %p1840_p7 = scmp.lt.s32.totalorder %s1834_s0, %s1834_s0 }
  0x32   :  { %p1841_p8 = por %p1840_p7, %p1839_p6 }
  0x34   :  { %p1842_p9 = pnand %p1841_p8, %p1835_p5 }
  0x36   :  { %1845 = shalt.err (!%p1842_p9)
}
  0x37   :  { %56 = dma.hbm_to_vmem [thread:$0]  %s2995_s4, 384, %s51_s11, [#allocation7], %s1900_s3, %s1900_s3, %s1901_s28  }
  0x38   :  { %s1846_s23 = scalar_lea.hbm %s2996_s5, 128 }
  0x39   :  { %p1847_p10 = scmp.ne.s32.totalorder %s2996_s5, %s1846_s23  ;;  %p1850_p11 = scmp.lt.u32.totalorder %s1846_s23, %s2996_s5 }
  0x3b   :  { %p1852_p12 = pnand %p1850_p11, %p1847_p10 }
  0x3d   :  { %1855 = shalt.err (!%p1852_p12)
}
  0x3e   :  { %s1856_s29 = scalar_lea.vmem %s64_s13, 128  ;;  %p1861_p0 = scmp.lt.s32.totalorder %s64_s13, %s64_s13 }
  0x3f   :  { %p1857_p13 = scmp.ne.s32.totalorder %s64_s13, %s1856_s29  ;;  %p1862_p1 = scmp.lt.s32.totalorder %s1856_s29, %s1856_s29 }
  0x41   :  { %p1863_p2 = por %p1862_p1, %p1861_p0 }
  0x43   :  { %p1864_p3 = pnand %p1863_p2, %p1857_p13 }
  0x45   :  { %1867 = shalt.err (!%p1864_p3)
}
  0x46   :  { %66 = dma.hbm_to_vmem [thread:$0]  %s2996_s5, 128, %s64_s13, [#allocation10]  }
  0x47   :  { %1890 = dma.done.wait [#allocation4], 256  }
  0x48   :  { %1891 = vsyncadd [#allocation4], 4294967040 }
  0x49   :  { %1892 = dma.done.wait [#allocation7], 512  }
  0x4a   :  { %1893 = vsyncadd [#allocation7], 4294966784 }
  0x4b   :  { %1894 = dma.done.wait [#allocation10], 128  }
  0x4c   :  { %1895 = vsyncadd [#allocation10], 4294967168  ;;  %v1904_v1 = vmov 0.0   ;;  %v1905_v2 = vmov 0   ;;  %v92_v3 = vld [vmem:[#allocation3] sm:$0xff]  ;;  %vm99_vm0 = vcmask 1043456   ;;  %v198_v13 = vlaneseq }
  0x4d   :  { %168 = vmatprep.mubr.f32.mxu1 %v1904_v1  ;;  %1752 = vset.pattern.permute.xlu0 %v1905_v2  ;;  %v2029_v4 = vld [vmem:[#allocation6] sm:$0xff]  ;;  %v94_v5 = vcombine.high %v92_v3, %v92_v3  ;;  %v2035_v6 = vld [vmem:[%s2993_s2] sm:$0xff]  ;;  %vm95_vm1 = vcmask 31744   ;;  %v1906_v7 = vmov 1   ;;  %s1907_s2 = smov 17   ;;  %s1908_s11 = smov 16  }
  0x4e   :  { %579 = vmatprep.mubr.f32.mxu0 %v1904_v1  ;;  %177 = vperm.xlu0 %1752, %v2029_v4   ;;  %v91_v8 = vld [vmem:[%s2992_s1] sm:$0xf]  ;;  %v2047_v14 = vshrl.u32 %v198_v13, 7  ;;  %s1909_s12 = smov 15   ;;  %s1910_s13 = smov 1   ;;  %v1915_v34 = vmov 2  }
  0x4f   :  { %1615 = vmatprep.subr.msk.mxu1 %vm99_vm0, %v94_v5  ;;  %v190_v9 = vsub.f32 0.0, %v91_v8  ;;  %s1911_s14 = smov 127   ;;  %s1912_s15 = smov 113   ;;  %1754 = vset.pattern.permute.xlu1 %v1915_v34  ;;  %v1916_v35 = vmov 3   ;;  %v2111_v40 = vand.u32 127, %v198_v13  ;;  %v87_v43 = vld [vmem:[%s2998_s7] sm:$0xff] }
  0x50   :  { %1616 = vmatpush1.msk.msra.mxu1 %vm99_vm0, %v92_v3  ;;  %v2052_v16 = vsub.s32 0, %v2047_v14  ;;  %v2057_v18 = vsub.s32 2, %v2047_v14  ;;  %s1913_s6 = smov 112   ;;  %s1914_s16 = smov 111   ;;  %v2114_v41 = vsub.s32 1, %v2047_v14  ;;  %v2120_v45 = vsub.s32 3, %v2047_v14 }
  0x51   :  { %1617 = vmatmul.mubr.msk.f32.vlgmr.msra.gmra.mrb[0].mxu1 %vm95_vm1, %v2035_v6  ;;  %v1618_v10 = vmul.f32 -1.442695, %v190_v9  ;;  %v88_v46 = vld [vmem:[%s2998_s7 + $0x8] sm:$0xff]  ;;  %vm241_vm2 = vcmp.lt.s32.totalorder %v2111_v40, 16  ;;  %vm275_vm3 = vcmp.lt.s32.totalorder %v2111_v40, 1  ;;  %v297_v49 = vsub.s32 5, %v2047_v14 }
  0x52   :  { %1753 = vset.pattern.permute.xlu0 %v1906_v7  ;;  %425 = vmatprep.mubr.f32.mxu1 %v1904_v1  ;;  %3001 = vst [vmem:[#allocation16_spill] sm:$0xff] %v2057_v18  ;;  %v2127_v47 = vrot.slane %v87_v43, %v2114_v41  ;;  %v2132_v50 = vrot.slane %v88_v46, %v2114_v41  ;;  %vm258_vm4 = vcmp.lt.s32.totalorder %v2111_v40, 15  ;;  %vm224_vm5 = vcmp.lt.s32.totalorder %v2111_v40, 17 }
  0x53   :  { %183 = vperm.xlu0 %1753, %v2029_v4   ;;  %1772 = vpow2.f32 %v1618_v10  ;;  %v2138_v52 = vrot.slane %v88_v46, %v2120_v45  ;;  %v2144_v55 = vrot.slane %v87_v43, %v2052_v16  ;;  %v2147_v56 = vrot.slane %v88_v46, %v2052_v16 }
  0x54   :  { %v2150_v57 = vrot.slane %v88_v46, %v2057_v18  ;;  %v2156_v60 = vrot.slane %v87_v43, %v2120_v45  ;;  %vm292_vm6 = vcmp.lt.s32.totalorder %v2111_v40, 127  ;;  %v2159_v62 = vrot.slane %v88_v46, %v297_v49 }
  0x55   :  { %vm309_vm7 = vcmp.lt.s32.totalorder %v2111_v40, 113  ;;  %vm326_vm8 = vcmp.lt.s32.totalorder %v2111_v40, 112  ;;  %vm343_vm9 = vcmp.lt.s32.totalorder %v2111_v40, 111  ;;  %vm357_vm10 = vcmask 588800  }
  0x56   :  { %vm1583_vm11 = vcmask 1040384  }
  0x57   :  { %1755 = vset.pattern.permute.xlu0 %v1916_v35 }
  0x5d   :  { %v1773_v11 = vpop.eup %1772 }
  0x5e   :  { %v194_v12 = vadd.f32 1.0, %v1773_v11 }
  0x60   :  { %1774 = vrcp.f32 %v194_v12  ;;  %v2174_v12 = vrot.slane %v87_v43, %v2057_v18 }
  0x6a   :  { %v2054_v17 = vpop.eup %1774 }
  0x6b   :  { %v201_v19 = vrot.slane %v2054_v17, %v2052_v16  ;;  %v205_v21 = vrot.slane %v2054_v17, %v2057_v18 }
  0x6d   :  { %v211_v26 = vrot.slane %v201_v19, %v2052_v16  ;;  %v215_v28 = vrot.slane %v205_v21, %v2052_v16 }
  0xcd   :  { %v2049_v15 = vpop.permute.xlu0 %177 }
  0xd2   :  { %v2063_v22 = vpop.permute.xlu0 %183 }
 0x124   :  { %v170_v20 = vpop.f32.mrb[0].mxu1 }
 0x125   :  { %v180_v23 = vmul.f32 %v2049_v15, %v170_v20  ;;  %v172_v24 = vpop.f32.mrb[1].mxu1 }
 0x126   :  { %v181_v25 = vmul.f32 %v2049_v15, %v172_v24 }
 0x127   :  { %v186_v27 = vadd.f32 %v2063_v22, %v180_v23 }
 0x128   :  { %v187_v29 = vadd.f32 %v2063_v22, %v181_v25 }
 0x129   :  { %v188_v30 = vmax.f32 %v186_v27, 0.0 }
 0x12a   :  { %v189_v31 = vmax.f32 %v187_v29, 0.0 }
 0x12b   :  { %v2071_v32 = vmul.f32 %v211_v26, %v188_v30  ;;  %v2180_v26 = vrot.slane %v87_v43, %v297_v49 }
 0x12c   :  { %v2073_v33 = vmul.f32 %v215_v28, %v189_v31  ;;  %v314_v28 = vsub.s32 6, %v2047_v14 }
 0x12d   :  { %218 = vrot.lane.b32.xlu1 %v2071_v32, %s1907_s2 }
 0x12e   :  { %239 = vrot.lane.b32.xlu0 %v2073_v33, %s1908_s11 }
 0x131   :  { %237 = vrot.lane.b32.xlu1 %v2071_v32, %s1908_s11 }
 0x132   :  { %256 = vrot.lane.b32.xlu0 %v2073_v33, %s1909_s12 }
 0x135   :  { %254 = vrot.lane.b32.xlu1 %v2071_v32, %s1909_s12 }
 0x136   :  { %273 = vrot.lane.b32.xlu0 %v2073_v33, %s1910_s13 }
 0x139   :  { %271 = vrot.lane.b32.xlu1 %v2071_v32, %s1910_s13 }
 0x13a   :  { %290 = vrot.lane.b32.xlu0 %v2073_v33, %s1911_s14 }
 0x13d   :  { %220 = vrot.lane.b32.xlu1 %v2073_v33, %s1907_s2 }
 0x13e   :  { %307 = vrot.lane.b32.xlu0 %v2073_v33, %s1912_s15 }
 0x141   :  { %288 = vrot.lane.b32.xlu1 %v2071_v32, %s1911_s14 }
 0x142   :  { %324 = vrot.lane.b32.xlu0 %v2073_v33, %s1913_s6 }
 0x145   :  { %305 = vrot.lane.b32.xlu1 %v2071_v32, %s1912_s15 }
 0x146   :  { %341 = vrot.lane.b32.xlu0 %v2073_v33, %s1914_s16 }
 0x149   :  { %322 = vrot.lane.b32.xlu1 %v2071_v32, %s1913_s6 }
 0x14a   :  { %439 = vperm.xlu0 %1755, %v2029_v4  }
 0x14d   :  { %339 = vrot.lane.b32.xlu1 %v2071_v32, %s1914_s16 }
 0x151   :  { %433 = vperm.xlu1 %1754, %v2029_v4  }
 0x19f   :  { %v219_v36 = vpop.permute.xlu1 %218 }
 0x1a0   :  { %v240_v37 = vpop.permute.xlu0 %239 }
 0x1a3   :  { %v238_v38 = vpop.permute.xlu1 %237 }
 0x1a4   :  { %v257_v39 = vpop.permute.xlu0 %256  ;;  %v243_v51 = vsel %vm241_vm2, %v240_v37, %v238_v38  ;;  %v242_v53 = vsel %vm241_vm2, %v238_v38, %v240_v37 }
 0x1a5   :  { %v252_v59 = vmul.f32 %v2127_v47, %v243_v51  ;;  %v253_v63 = vmul.f32 %v2132_v50, %v242_v53 }
 0x1a7   :  { %v255_v42 = vpop.permute.xlu1 %254 }
 0x1a8   :  { %v274_v44 = vpop.permute.xlu0 %273  ;;  %v259_v0 = vsel %vm258_vm4, %v255_v42, %v257_v39  ;;  %v260_v13 = vsel %vm258_vm4, %v257_v39, %v255_v42 }
 0x1a9   :  { %v270_v19 = vmul.f32 %v2150_v57, %v259_v0  ;;  %v269_v37 = vmul.f32 %v2174_v12, %v260_v13  ;;  %v2226_v13 = vld [vmem:[%s2998_s7 + $0x10] ss:$0 sm:$0xff] }
 0x1ab   :  { %v272_v48 = vpop.permute.xlu1 %271 }
 0x1ac   :  { %v291_v54 = vpop.permute.xlu0 %290  ;;  %v276_v58 = vsel %vm275_vm3, %v272_v48, %v274_v44  ;;  %v277_v8 = vsel %vm275_vm3, %v274_v44, %v272_v48  ;;  %v2192_v44 = vrot.slane %v87_v43, %v314_v28  ;;  %v2194_v48 = vrot.slane %v88_v46, %v314_v28 }
 0x1ad   :  { %v287_v9 = vmul.f32 %v2138_v52, %v276_v58  ;;  %v286_v25 = vmul.f32 %v2156_v60, %v277_v8 }
 0x1af   :  { %v221_v61 = vpop.permute.xlu1 %220  ;;  %v1635_v31 = vpack.c.bf16 %v287_v9, %v270_v19  ;;  %v1637_v39 = vpack.c.bf16 %v286_v25, %v269_v37 }
 0x1b0   :  { %v225_v3 = vsel %vm224_vm5, %v219_v36, %v221_v61  ;;  %v226_v5 = vsel %vm224_vm5, %v221_v61, %v219_v36  ;;  %v308_v21 = vpop.permute.xlu0 %307  ;;  %v331_v36 = vsub.s32 7, %v2047_v14 }
 0x1b1   :  { %v235_v10 = vmul.f32 %v2144_v55, %v226_v5  ;;  %v236_v11 = vmul.f32 %v2147_v56, %v225_v3 }
 0x1b2   :  { %v2198_v14 = vrot.slane %v87_v43, %v331_v36  ;;  %v2200_v53 = vrot.slane %v88_v46, %v331_v36 }
 0x1b3   :  { %v1633_v20 = vpack.c.bf16 %v252_v59, %v235_v10  ;;  %v289_v23 = vpop.permute.xlu1 %288  ;;  %v1631_v24 = vpack.c.bf16 %v253_v63, %v236_v11 }
 0x1b4   :  { %v294_v27 = vsel %vm292_vm6, %v291_v54, %v289_v23  ;;  %v293_v29 = vsel %vm292_vm6, %v289_v23, %v291_v54  ;;  %v325_v49 = vpop.permute.xlu0 %324  ;;  %v2232_v23 = vld [vmem:[#allocation8] sm:$0xff] }
 0x1b5   :  { %v304_v30 = vmul.f32 %v2159_v62, %v294_v27  ;;  %1632 = vmatprep.subr.bf16.mxu1 %v1631_v24  ;;  %v303_v42 = vmul.f32 %v2180_v26, %v293_v29 }
 0x1b6   :  { %1634 = vmatpush1.bf16.msra.mxu1 %v1633_v20 }
 0x1b7   :  { %1636 = vmatprep.subr.bf16.mxu1 %v1635_v31  ;;  %v306_v38 = vpop.permute.xlu1 %305  ;;  %v1639_v51 = vpack.c.bf16 %v304_v30, %v2073_v33  ;;  %v1641_v61 = vpack.c.bf16 %v303_v42, %v2071_v32  ;;  %v2219_v32 = vld [vmem:[%s2998_s7 + $0x18] ss:$0 sm:$0xff] }
 0x1b8   :  { %v310_v54 = vsel %vm309_vm7, %v306_v38, %v308_v21  ;;  %v311_v58 = vsel %vm309_vm7, %v308_v21, %v306_v38  ;;  %v342_v5 = vpop.permute.xlu0 %341 }
 0x1b9   :  { %v320_v46 = vmul.f32 %v2192_v44, %v310_v54  ;;  %v321_v63 = vmul.f32 %v2194_v48, %v311_v58 }
 0x1ba   :  { %1638 = vmatpush1.bf16.msra.mxu1 %v1637_v39 }
 0x1bb   :  { %1640 = vmatprep.subr.bf16.mxu1 %v1639_v51  ;;  %v323_v59 = vpop.permute.xlu1 %322 }
 0x1bc   :  { %v327_v33 = vsel %vm326_vm8, %v323_v59, %v325_v49  ;;  %v328_v43 = vsel %vm326_vm8, %v325_v49, %v323_v59 }
 0x1bd   :  { %v337_v0 = vmul.f32 %v2198_v14, %v327_v33  ;;  %v338_v3 = vmul.f32 %v2200_v53, %v328_v43 }
 0x1be   :  { %1642 = vmatpush1.bf16.msra.mxu1 %v1641_v61 }
 0x1bf   :  { %v1645_v8 = vpack.c.bf16 %v337_v0, %v320_v46  ;;  %v340_v9 = vpop.permute.xlu1 %339  ;;  %v1643_v10 = vpack.c.bf16 %v338_v3, %v321_v63 }
 0x1c0   :  { %v345_v11 = vsel %vm343_vm9, %v342_v5, %v340_v9  ;;  %v344_v19 = vsel %vm343_vm9, %v340_v9, %v342_v5 }
 0x1c1   :  { %1644 = vmatprep.subr.bf16.mxu1 %v1643_v10  ;;  %v355_v20 = vmul.f32 %v2219_v32, %v345_v11  ;;  %v354_v21 = vmul.f32 %v2226_v13, %v344_v19 }
 0x1c2   :  { %1646 = vmatpush1.bf16.msra.mxu1 %v1645_v8 }
 0x1c3   :  { %377 = vmatprep.subr.mxu1 %v355_v20 }
 0x1c6   :  { %378 = vmatpush1.msra.mxu1 %v354_v21 }
 0x1c7   :  { %1621 = vmatmul.mubr.msk.f32.vlgmr.msra.gmra.mrb[2].mxu1 %vm357_vm10, %v2232_v23 }
 0x1c8   :  { %733 = vmatprep.mubr.f32.mxu1 %v1904_v1 }
 0x1c9   :  { %v2239_v27 = vpop.permute.xlu0 %439 }
 0x1d0   :  { %v2237_v24 = vpop.permute.xlu1 %433 }
 0x29a   :  { %v427_v25 = vpop.f32.mrb[2].mxu1 }
 0x29b   :  { %v436_v28 = vmul.f32 %v2237_v24, %v427_v25  ;;  %v429_v29 = vpop.f32.mrb[3].mxu1 }
 0x29c   :  { %v437_v30 = vmul.f32 %v2237_v24, %v429_v29 }
 0x29d   :  { %v442_v31 = vadd.f32 %v2239_v27, %v436_v28 }
 0x29e   :  { %v443_v36 = vadd.f32 %v2239_v27, %v437_v30 }
 0x29f   :  { %v2245_v37 = vmax.f32 %v442_v31, 0.0 }
 0x2a0   :  { %v445_v38 = vmax.f32 %v443_v36, 0.0 }
 0x2a1   :  { %454 = vrot.lane.b32.xlu0 %v2245_v37, %s1908_s11  ;;  %446 = vrot.lane.b32.xlu1 %v2245_v37, %s1907_s2 }
 0x2a5   :  { %462 = vrot.lane.b32.xlu0 %v2245_v37, %s1909_s12  ;;  %448 = vrot.lane.b32.xlu1 %v445_v38, %s1907_s2 }
 0x2a9   :  { %470 = vrot.lane.b32.xlu0 %v2245_v37, %s1910_s13  ;;  %456 = vrot.lane.b32.xlu1 %v445_v38, %s1908_s11 }
 0x2ad   :  { %478 = vrot.lane.b32.xlu0 %v2245_v37, %s1911_s14  ;;  %464 = vrot.lane.b32.xlu1 %v445_v38, %s1909_s12 }
 0x2b1   :  { %486 = vrot.lane.b32.xlu0 %v2245_v37, %s1912_s15  ;;  %472 = vrot.lane.b32.xlu1 %v445_v38, %s1910_s13 }
 0x2b5   :  { %494 = vrot.lane.b32.xlu0 %v2245_v37, %s1913_s6  ;;  %480 = vrot.lane.b32.xlu1 %v445_v38, %s1911_s14 }
 0x2b9   :  { %502 = vrot.lane.b32.xlu0 %v2245_v37, %s1914_s16  ;;  %488 = vrot.lane.b32.xlu1 %v445_v38, %s1912_s15 }
 0x2bd   :  { %496 = vrot.lane.b32.xlu1 %v445_v38, %s1913_s6 }
 0x2c1   :  { %504 = vrot.lane.b32.xlu1 %v445_v38, %s1914_s16 }
 0x313   :  { %v455_v39 = vpop.permute.xlu0 %454  ;;  %v447_v42 = vpop.permute.xlu1 %446 }
 0x317   :  { %v463_v49 = vpop.permute.xlu0 %462  ;;  %v449_v51 = vpop.permute.xlu1 %448 }
 0x318   :  { %v451_v54 = vsel %vm224_vm5, %v449_v51, %v447_v42  ;;  %v450_v58 = vsel %vm224_vm5, %v447_v42, %v449_v51 }
 0x319   :  { %v453_v46 = vmul.f32 %v450_v58, %v2147_v56  ;;  %v452_v0 = vmul.f32 %v451_v54, %v2144_v55 }
 0x31b   :  { %v471_v59 = vpop.permute.xlu0 %470  ;;  %v457_v61 = vpop.permute.xlu1 %456 }
 0x31c   :  { %v459_v33 = vsel %vm241_vm2, %v457_v61, %v455_v39  ;;  %v458_v43 = vsel %vm241_vm2, %v455_v39, %v457_v61 }
 0x31d   :  { %v461_v63 = vmul.f32 %v458_v43, %v2132_v50  ;;  %v460_v3 = vmul.f32 %v459_v33, %v2127_v47 }
 0x31f   :  { %v465_v5 = vpop.permute.xlu1 %464  ;;  %v1647_v8 = vpack.c.bf16 %v461_v63, %v453_v46  ;;  %v1649_v9 = vpack.c.bf16 %v460_v3, %v452_v0  ;;  %v479_v10 = vpop.permute.xlu0 %478 }
 0x320   :  { %v466_v11 = vsel %vm258_vm4, %v463_v49, %v465_v5  ;;  %v467_v19 = vsel %vm258_vm4, %v465_v5, %v463_v49 }
 0x321   :  { %1648 = vmatprep.subr.bf16.mxu0 %v1647_v8  ;;  %v468_v28 = vmul.f32 %v467_v19, %v2174_v12  ;;  %v469_v29 = vmul.f32 %v466_v11, %v2150_v57 }
 0x322   :  { %1650 = vmatpush1.bf16.msra.mxu0 %v1649_v9 }
 0x323   :  { %v473_v20 = vpop.permute.xlu1 %472  ;;  %v487_v36 = vpop.permute.xlu0 %486 }
 0x324   :  { %v474_v21 = vsel %vm275_vm3, %v471_v59, %v473_v20  ;;  %v475_v25 = vsel %vm275_vm3, %v473_v20, %v471_v59 }
 0x325   :  { %v476_v30 = vmul.f32 %v475_v25, %v2156_v60  ;;  %v477_v31 = vmul.f32 %v474_v21, %v2138_v52 }
 0x327   :  { %v481_v39 = vpop.permute.xlu1 %480  ;;  %v1651_v42 = vpack.c.bf16 %v477_v31, %v469_v29  ;;  %v1653_v49 = vpack.c.bf16 %v476_v30, %v468_v28  ;;  %v495_v46 = vpop.permute.xlu0 %494  ;;  %v926_v28 = vld [vmem:[#allocation3 + $0x8] sm:$0xff] }
 0x328   :  { %v482_v51 = vsel %vm292_vm6, %v479_v10, %v481_v39  ;;  %v483_v54 = vsel %vm292_vm6, %v481_v39, %v479_v10  ;;  %v928_v31 = vcombine.high %v926_v28, %v926_v28  ;;  %v2320_v39 = vld [vmem:[#allocation8 + $0x8] sm:$0xff] }
 0x329   :  { %v484_v58 = vmul.f32 %v482_v51, %v2180_v26  ;;  %v485_v59 = vmul.f32 %v483_v54, %v2159_v62  ;;  %1652 = vmatprep.subr.bf16.mxu0 %v1651_v42  ;;  %v1917_v42 = vmov 4  }
 0x32a   :  { %1654 = vmatpush1.bf16.msra.mxu0 %v1653_v49  ;;  %1756 = vset.pattern.permute.xlu0 %v1917_v42  ;;  %v1918_v49 = vmov 5  }
 0x32b   :  { %v489_v61 = vpop.permute.xlu1 %488  ;;  %v1655_v33 = vpack.c.bf16 %v485_v59, %v445_v38  ;;  %v1657_v43 = vpack.c.bf16 %v484_v58, %v2245_v37  ;;  %v503_v11 = vpop.permute.xlu0 %502  ;;  %1757 = vset.pattern.permute.xlu1 %v1918_v49  ;;  %v1013_v58 = vrot.slane %v2054_v17, %v2114_v41 }
 0x32c   :  { %v490_v63 = vsel %vm309_vm7, %v487_v36, %v489_v61  ;;  %v491_v0 = vsel %vm309_vm7, %v489_v61, %v487_v36  ;;  %v1017_v61 = vrot.slane %v2054_v17, %v2120_v45 }
 0x32d   :  { %1656 = vmatprep.subr.bf16.mxu0 %v1655_v33  ;;  %v492_v38 = vmul.f32 %v490_v63, %v2192_v44  ;;  %v493_v37 = vmul.f32 %v491_v0, %v2194_v48  ;;  %v1023_v63 = vrot.slane %v1013_v58, %v2114_v41 }
 0x32e   :  { %1658 = vmatpush1.bf16.msra.mxu0 %v1657_v43 }
 0x32f   :  { %v497_v3 = vpop.permute.xlu1 %496 }
 0x330   :  { %v498_v5 = vsel %vm326_vm8, %v495_v46, %v497_v3  ;;  %v499_v8 = vsel %vm326_vm8, %v497_v3, %v495_v46  ;;  %v1027_v3 = vrot.slane %v1017_v61, %v2114_v41 }
 0x331   :  { %v500_v9 = vmul.f32 %v498_v5, %v2198_v14  ;;  %v501_v10 = vmul.f32 %v499_v8, %v2200_v53 }
 0x333   :  { %v505_v19 = vpop.permute.xlu1 %504  ;;  %v1659_v20 = vpack.c.bf16 %v501_v10, %v493_v37  ;;  %v1661_v21 = vpack.c.bf16 %v500_v9, %v492_v38 }
 0x334   :  { %v507_v25 = vsel %vm343_vm9, %v505_v19, %v503_v11  ;;  %v506_v29 = vsel %vm343_vm9, %v503_v11, %v505_v19 }
 0x335   :  { %1660 = vmatprep.subr.bf16.mxu0 %v1659_v20  ;;  %v509_v30 = vmul.f32 %v2219_v32, %v507_v25  ;;  %v508_v36 = vmul.f32 %v2226_v13, %v506_v29 }
 0x336   :  { %1662 = vmatpush1.bf16.msra.mxu0 %v1661_v21 }
 0x337   :  { %531 = vmatprep.subr.mxu0 %v509_v30 }
 0x33a   :  { %532 = vmatpush1.msra.mxu0 %v508_v36 }
 0x33b   :  { %1622 = vmatmul.mubr.msk.f32.vlgmr.msra.gmra.mrb[0].mxu0 %vm357_vm10, %v2320_v39  ;;  %1624 = vmatprep.subr.msk.mxu0 %vm99_vm0, %v928_v31 }
 0x33c   :  { %1625 = vmatpush1.msk.msra.mxu0 %vm99_vm0, %v926_v28  ;;  %997 = vmatprep.mubr.f32.mxu0 %v1904_v1 }
 0x33f   :  { %1626 = vmatmul.mubr.msk.f32.vlgmr.msra.gmra.mrb[2].mxu0 %vm95_vm1, %v2035_v6 }
 0x340   :  { %1158 = vmatprep.mubr.f32.mxu0 %v1904_v1 }
 0x40e   :  { %v2332_v51 = vpop.f32.mrb[0].mxu0 }
 0x40f   :  { %v2334_v54 = vpop.f32.mrb[1].mxu0 }
 0x412   :  { %v999_v59 = vpop.f32.mrb[2].mxu0 }
 0x413   :  { %v1004_v6 = vmul.f32 %v999_v59, %v2049_v15  ;;  %v1001_v33 = vpop.f32.mrb[3].mxu0 }
 0x414   :  { %v1005_v43 = vmul.f32 %v1001_v33, %v2049_v15 }
 0x415   :  { %v1006_v46 = vadd.f32 %v1004_v6, %v2063_v22 }
 0x416   :  { %v1007_v0 = vadd.f32 %v1005_v43, %v2063_v22 }
 0x417   :  { %v1008_v5 = vmax.f32 %v1006_v46, 0.0 }
 0x418   :  { %v1009_v8 = vmax.f32 %v1007_v0, 0.0 }
 0x419   :  { %v2346_v38 = vmul.f32 %v1023_v63, %v1008_v5 }
 0x41a   :  { %v1029_v37 = vmul.f32 %v1027_v3, %v1009_v8 }
 0x41b   :  { %1030 = vrot.lane.b32.xlu0 %v2346_v38, %s1907_s2 }
 0x41c   :  { %1032 = vrot.lane.b32.xlu1 %v1029_v37, %s1907_s2 }
 0x41f   :  { %1038 = vrot.lane.b32.xlu0 %v2346_v38, %s1908_s11 }
 0x420   :  { %1040 = vrot.lane.b32.xlu1 %v1029_v37, %s1908_s11 }
 0x423   :  { %1046 = vrot.lane.b32.xlu0 %v2346_v38, %s1909_s12 }
 0x424   :  { %1048 = vrot.lane.b32.xlu1 %v1029_v37, %s1909_s12 }
 0x427   :  { %1054 = vrot.lane.b32.xlu0 %v2346_v38, %s1910_s13 }
 0x428   :  { %1056 = vrot.lane.b32.xlu1 %v1029_v37, %s1910_s13 }
 0x42b   :  { %1062 = vrot.lane.b32.xlu0 %v2346_v38, %s1911_s14 }
 0x42c   :  { %1064 = vrot.lane.b32.xlu1 %v1029_v37, %s1911_s14 }
 0x42f   :  { %1070 = vrot.lane.b32.xlu0 %v2346_v38, %s1912_s15 }
 0x430   :  { %1072 = vrot.lane.b32.xlu1 %v1029_v37, %s1912_s15 }
 0x433   :  { %1078 = vrot.lane.b32.xlu0 %v2346_v38, %s1913_s6 }
 0x434   :  { %1080 = vrot.lane.b32.xlu1 %v1029_v37, %s1913_s6 }
 0x437   :  { %1086 = vrot.lane.b32.xlu0 %v2346_v38, %s1914_s16 }
 0x438   :  { %1088 = vrot.lane.b32.xlu1 %v1029_v37, %s1914_s16 }
 0x43b   :  { %587 = vperm.xlu0 %1756, %v2029_v4  }
 0x43c   :  { %593 = vperm.xlu1 %1757, %v2029_v4  }
 0x48d   :  { %v1031_v15 = vpop.permute.xlu0 %1030 }
 0x48e   :  { %v1033_v17 = vpop.permute.xlu1 %1032 }
 0x48f   :  { %v1034_v22 = vsel %vm224_vm5, %v1031_v15, %v1033_v17  ;;  %v1035_v9 = vsel %vm224_vm5, %v1033_v17, %v1031_v15 }
 0x490   :  { %v1036_v21 = vmul.f32 %v1035_v9, %v2144_v55  ;;  %v1037_v4 = vmul.f32 %v1034_v22, %v2147_v56 }
 0x491   :  { %v1039_v10 = vpop.permute.xlu0 %1038 }
 0x492   :  { %v1041_v11 = vpop.permute.xlu1 %1040 }
 0x493   :  { %v1042_v19 = vsel %vm241_vm2, %v1039_v10, %v1041_v11  ;;  %v1043_v20 = vsel %vm241_vm2, %v1041_v11, %v1039_v10 }
 0x494   :  { %v1044_v25 = vmul.f32 %v1043_v20, %v2127_v47  ;;  %v1045_v28 = vmul.f32 %v1042_v19, %v2132_v50 }
 0x495   :  { %v1047_v29 = vpop.permute.xlu0 %1046 }
 0x496   :  { %v1681_v30 = vpack.c.bf16 %v1044_v25, %v1036_v21  ;;  %v1049_v31 = vpop.permute.xlu1 %1048  ;;  %v1679_v36 = vpack.c.bf16 %v1045_v28, %v1037_v4 }
 0x497   :  { %v1050_v58 = vsel %vm258_vm4, %v1047_v29, %v1049_v31  ;;  %v1051_v59 = vsel %vm258_vm4, %v1049_v31, %v1047_v29 }
 0x498   :  { %1680 = vmatprep.subr.bf16.mxu0 %v1679_v36  ;;  %v1052_v46 = vmul.f32 %v1051_v59, %v2174_v12  ;;  %v1053_v63 = vmul.f32 %v1050_v58, %v2150_v57 }
 0x499   :  { %v1055_v61 = vpop.permute.xlu0 %1054  ;;  %1682 = vmatpush1.bf16.msra.mxu0 %v1681_v30 }
 0x49a   :  { %v1057_v6 = vpop.permute.xlu1 %1056 }
 0x49b   :  { %v1058_v33 = vsel %vm275_vm3, %v1055_v61, %v1057_v6  ;;  %v1059_v43 = vsel %vm275_vm3, %v1057_v6, %v1055_v61 }
 0x49c   :  { %v1060_v0 = vmul.f32 %v1059_v43, %v2156_v60  ;;  %v1061_v3 = vmul.f32 %v1058_v33, %v2138_v52 }
 0x49d   :  { %v1063_v5 = vpop.permute.xlu0 %1062 }
 0x49e   :  { %v1685_v8 = vpack.c.bf16 %v1060_v0, %v1052_v46  ;;  %v1065_v15 = vpop.permute.xlu1 %1064  ;;  %v1683_v17 = vpack.c.bf16 %v1061_v3, %v1053_v63 }
 0x49f   :  { %v1066_v22 = vsel %vm292_vm6, %v1063_v5, %v1065_v15  ;;  %v1067_v9 = vsel %vm292_vm6, %v1065_v15, %v1063_v5 }
 0x4a0   :  { %v1068_v10 = vmul.f32 %v1066_v22, %v2180_v26  ;;  %v1069_v11 = vmul.f32 %v1067_v9, %v2159_v62  ;;  %1684 = vmatprep.subr.bf16.mxu0 %v1683_v17 }
 0x4a1   :  { %v1071_v19 = vpop.permute.xlu0 %1070  ;;  %1686 = vmatpush1.bf16.msra.mxu0 %v1685_v8 }
 0x4a2   :  { %v1689_v20 = vpack.c.bf16 %v1068_v10, %v2346_v38  ;;  %v1073_v21 = vpop.permute.xlu1 %1072  ;;  %v1687_v4 = vpack.c.bf16 %v1069_v11, %v1029_v37 }
 0x4a3   :  { %v1074_v25 = vsel %vm309_vm7, %v1071_v19, %v1073_v21  ;;  %v1075_v28 = vsel %vm309_vm7, %v1073_v21, %v1071_v19 }
 0x4a4   :  { %1688 = vmatprep.subr.bf16.mxu0 %v1687_v4  ;;  %v1076_v38 = vmul.f32 %v1074_v25, %v2192_v44  ;;  %v1077_v37 = vmul.f32 %v1075_v28, %v2194_v48 }
 0x4a5   :  { %v1079_v29 = vpop.permute.xlu0 %1078  ;;  %1690 = vmatpush1.bf16.msra.mxu0 %v1689_v20 }
 0x4a6   :  { %v1081_v30 = vpop.permute.xlu1 %1080 }
 0x4a7   :  { %v1082_v31 = vsel %vm326_vm8, %v1079_v29, %v1081_v30  ;;  %v1083_v36 = vsel %vm326_vm8, %v1081_v30, %v1079_v29 }
 0x4a8   :  { %v1084_v58 = vmul.f32 %v1082_v31, %v2198_v14  ;;  %v1085_v59 = vmul.f32 %v1083_v36, %v2200_v53 }
 0x4a9   :  { %v1087_v61 = vpop.permute.xlu0 %1086 }
 0x4aa   :  { %v1693_v6 = vpack.c.bf16 %v1084_v58, %v1076_v38  ;;  %v1089_v33 = vpop.permute.xlu1 %1088  ;;  %v1691_v43 = vpack.c.bf16 %v1085_v59, %v1077_v37 }
 0x4ab   :  { %v1091_v46 = vsel %vm343_vm9, %v1089_v33, %v1087_v61  ;;  %v1090_v63 = vsel %vm343_vm9, %v1087_v61, %v1089_v33 }
 0x4ac   :  { %1692 = vmatprep.subr.bf16.mxu0 %v1691_v43  ;;  %v1093_v0 = vmul.f32 %v2219_v32, %v1091_v46  ;;  %v1092_v3 = vmul.f32 %v2226_v13, %v1090_v63 }
 0x4ad   :  { %1694 = vmatpush1.bf16.msra.mxu0 %v1693_v6 }
 0x4ae   :  { %1110 = vmatprep.subr.mxu0 %v1093_v0 }
 0x4b1   :  { %1111 = vmatpush1.msra.mxu0 %v1092_v3 }
 0x4b2   :  { %1627 = vmatmul.mubr.msk.f32.vlgmr.msra.gmra.mrb[4].mxu0 %vm357_vm10, %v2232_v23 }
 0x4b3   :  { %1440 = vmatprep.mubr.f32.mxu0 %v1904_v1 }
 0x4ba   :  { %v2426_v5 = vpop.permute.xlu0 %587 }
 0x4bb   :  { %v590_v8 = vmul.f32 %v2426_v5, %v2332_v51  ;;  %v591_v15 = vmul.f32 %v2426_v5, %v2334_v54  ;;  %v2432_v17 = vpop.permute.xlu1 %593 }
 0x4bd   :  { %v596_v22 = vadd.f32 %v2432_v17, %v590_v8  ;;  %v597_v9 = vadd.f32 %v2432_v17, %v591_v15 }
 0x4bf   :  { %v2436_v10 = vmax.f32 %v596_v22, 0.0  ;;  %v599_v11 = vmax.f32 %v597_v9, 0.0 }
 0x4c1   :  { %602 = vrot.lane.b32.xlu0 %v599_v11, %s1907_s2  ;;  %600 = vrot.lane.b32.xlu1 %v2436_v10, %s1907_s2 }
 0x4c5   :  { %610 = vrot.lane.b32.xlu0 %v599_v11, %s1908_s11  ;;  %608 = vrot.lane.b32.xlu1 %v2436_v10, %s1908_s11 }
 0x4c9   :  { %618 = vrot.lane.b32.xlu0 %v599_v11, %s1909_s12  ;;  %616 = vrot.lane.b32.xlu1 %v2436_v10, %s1909_s12 }
 0x4cd   :  { %626 = vrot.lane.b32.xlu0 %v599_v11, %s1910_s13  ;;  %624 = vrot.lane.b32.xlu1 %v2436_v10, %s1910_s13 }
 0x4d1   :  { %634 = vrot.lane.b32.xlu0 %v599_v11, %s1911_s14  ;;  %632 = vrot.lane.b32.xlu1 %v2436_v10, %s1911_s14 }
 0x4d5   :  { %642 = vrot.lane.b32.xlu0 %v599_v11, %s1912_s15  ;;  %640 = vrot.lane.b32.xlu1 %v2436_v10, %s1912_s15 }
 0x4d9   :  { %650 = vrot.lane.b32.xlu0 %v599_v11, %s1913_s6  ;;  %648 = vrot.lane.b32.xlu1 %v2436_v10, %s1913_s6 }
 0x4dd   :  { %658 = vrot.lane.b32.xlu0 %v599_v11, %s1914_s16  ;;  %656 = vrot.lane.b32.xlu1 %v2436_v10, %s1914_s16 }
 0x533   :  { %v603_v23 = vpop.permute.xlu0 %602  ;;  %v601_v51 = vpop.permute.xlu1 %600 }
 0x534   :  { %v604_v54 = vsel %vm224_vm5, %v601_v51, %v603_v23  ;;  %v605_v19 = vsel %vm224_vm5, %v603_v23, %v601_v51 }
 0x535   :  { %v606_v28 = vmul.f32 %v605_v19, %v2144_v55  ;;  %v607_v29 = vmul.f32 %v604_v54, %v2147_v56 }
 0x537   :  { %v611_v20 = vpop.permute.xlu0 %610  ;;  %v609_v21 = vpop.permute.xlu1 %608 }
 0x538   :  { %v612_v4 = vsel %vm241_vm2, %v609_v21, %v611_v20  ;;  %v613_v25 = vsel %vm241_vm2, %v611_v20, %v609_v21 }
 0x539   :  { %v614_v30 = vmul.f32 %v613_v25, %v2127_v47  ;;  %v615_v31 = vmul.f32 %v612_v4, %v2132_v50 }
 0x53b   :  { %v1665_v36 = vpack.c.bf16 %v614_v30, %v606_v28  ;;  %v619_v38 = vpop.permute.xlu0 %618  ;;  %v617_v37 = vpop.permute.xlu1 %616  ;;  %v1663_v58 = vpack.c.bf16 %v615_v31, %v607_v29 }
 0x53c   :  { %v620_v59 = vsel %vm258_vm4, %v617_v37, %v619_v38  ;;  %v621_v61 = vsel %vm258_vm4, %v619_v38, %v617_v37 }
 0x53d   :  { %1664 = vmatprep.subr.bf16.mxu1 %v1663_v58  ;;  %v622_v63 = vmul.f32 %v621_v61, %v2174_v12  ;;  %v623_v0 = vmul.f32 %v620_v59, %v2150_v57 }
 0x53e   :  { %1666 = vmatpush1.bf16.msra.mxu1 %v1665_v36 }
 0x53f   :  { %v627_v6 = vpop.permute.xlu0 %626  ;;  %v625_v33 = vpop.permute.xlu1 %624 }
 0x540   :  { %v628_v43 = vsel %vm275_vm3, %v625_v33, %v627_v6  ;;  %v629_v46 = vsel %vm275_vm3, %v627_v6, %v625_v33 }
 0x541   :  { %v630_v3 = vmul.f32 %v629_v46, %v2156_v60  ;;  %v631_v8 = vmul.f32 %v628_v43, %v2138_v52 }
 0x543   :  { %v1669_v15 = vpack.c.bf16 %v630_v3, %v622_v63  ;;  %v635_v22 = vpop.permute.xlu0 %634  ;;  %v633_v9 = vpop.permute.xlu1 %632  ;;  %v1667_v23 = vpack.c.bf16 %v631_v8, %v623_v0 }
 0x544   :  { %v636_v51 = vsel %vm292_vm6, %v633_v9, %v635_v22  ;;  %v637_v54 = vsel %vm292_vm6, %v635_v22, %v633_v9 }
 0x545   :  { %v638_v19 = vmul.f32 %v636_v51, %v2180_v26  ;;  %v639_v20 = vmul.f32 %v637_v54, %v2159_v62  ;;  %1668 = vmatprep.subr.bf16.mxu1 %v1667_v23  ;;  %v2515_v54 = vld [vmem:[#allocation8 + $0x10] sm:$0xff] }
 0x546   :  { %1670 = vmatpush1.bf16.msra.mxu1 %v1669_v15 }
 0x547   :  { %v1673_v21 = vpack.c.bf16 %v638_v19, %v2436_v10  ;;  %v643_v4 = vpop.permute.xlu0 %642  ;;  %v641_v25 = vpop.permute.xlu1 %640  ;;  %v1671_v28 = vpack.c.bf16 %v639_v20, %v599_v11 }
 0x548   :  { %v644_v29 = vsel %vm309_vm7, %v641_v25, %v643_v4  ;;  %v645_v30 = vsel %vm309_vm7, %v643_v4, %v641_v25 }
 0x549   :  { %1672 = vmatprep.subr.bf16.mxu1 %v1671_v28  ;;  %v646_v10 = vmul.f32 %v644_v29, %v2192_v44  ;;  %v647_v11 = vmul.f32 %v645_v30, %v2194_v48 }
 0x54a   :  { %1674 = vmatpush1.bf16.msra.mxu1 %v1673_v21 }
 0x54b   :  { %v651_v31 = vpop.permute.xlu0 %650  ;;  %v649_v36 = vpop.permute.xlu1 %648 }
 0x54c   :  { %v652_v38 = vsel %vm326_vm8, %v649_v36, %v651_v31  ;;  %v653_v37 = vsel %vm326_vm8, %v651_v31, %v649_v36 }
 0x54d   :  { %v654_v58 = vmul.f32 %v652_v38, %v2198_v14  ;;  %v655_v59 = vmul.f32 %v653_v37, %v2200_v53 }
 0x54f   :  { %v1677_v61 = vpack.c.bf16 %v654_v58, %v646_v10  ;;  %v659_v6 = vpop.permute.xlu0 %658  ;;  %v657_v33 = vpop.permute.xlu1 %656  ;;  %v1675_v43 = vpack.c.bf16 %v655_v59, %v647_v11 }
 0x550   :  { %v661_v46 = vsel %vm343_vm9, %v659_v6, %v657_v33  ;;  %v660_v63 = vsel %vm343_vm9, %v657_v33, %v659_v6 }
 0x551   :  { %v663_v0 = vmul.f32 %v2219_v32, %v661_v46  ;;  %1676 = vmatprep.subr.bf16.mxu1 %v1675_v43  ;;  %v662_v3 = vmul.f32 %v2226_v13, %v660_v63 }
 0x552   :  { %1678 = vmatpush1.bf16.msra.mxu1 %v1677_v61 }
 0x553   :  { %685 = vmatprep.subr.mxu1 %v663_v0 }
 0x556   :  { %686 = vmatpush1.msra.mxu1 %v662_v3 }
 0x557   :  { %1623 = vmatmul.mubr.msk.f32.vlgmr.msra.gmra.mrb[4].mxu1 %vm357_vm10, %v2515_v54 }
 0x558   :  { %1299 = vmatprep.mubr.f32.mxu1 %v1904_v1 }
 0x585   :  { %v1160_v8 = vpop.f32.mrb[4].mxu0 }
 0x586   :  { %v1165_v15 = vmul.f32 %v1160_v8, %v2237_v24  ;;  %v1162_v22 = vpop.f32.mrb[5].mxu0 }
 0x587   :  { %v1166_v9 = vmul.f32 %v1162_v22, %v2237_v24 }
 0x588   :  { %v1167_v23 = vadd.f32 %v1165_v15, %v2239_v27 }
 0x589   :  { %v1168_v51 = vadd.f32 %v1166_v9, %v2239_v27 }
 0x58a   :  { %v2517_v19 = vmax.f32 %v1167_v23, 0.0 }
 0x58b   :  { %v1170_v20 = vmax.f32 %v1168_v51, 0.0 }
 0x58c   :  { %1171 = vrot.lane.b32.xlu1 %v2517_v19, %s1907_s2 }
 0x58d   :  { %1173 = vrot.lane.b32.xlu0 %v1170_v20, %s1907_s2 }
 0x590   :  { %1179 = vrot.lane.b32.xlu1 %v2517_v19, %s1908_s11 }
 0x591   :  { %1181 = vrot.lane.b32.xlu0 %v1170_v20, %s1908_s11 }
 0x594   :  { %1187 = vrot.lane.b32.xlu1 %v2517_v19, %s1909_s12 }
 0x595   :  { %1189 = vrot.lane.b32.xlu0 %v1170_v20, %s1909_s12 }
 0x598   :  { %1195 = vrot.lane.b32.xlu1 %v2517_v19, %s1910_s13 }
 0x599   :  { %1197 = vrot.lane.b32.xlu0 %v1170_v20, %s1910_s13 }
 0x59c   :  { %1203 = vrot.lane.b32.xlu1 %v2517_v19, %s1911_s14 }
 0x59d   :  { %1205 = vrot.lane.b32.xlu0 %v1170_v20, %s1911_s14 }
 0x5a0   :  { %1211 = vrot.lane.b32.xlu1 %v2517_v19, %s1912_s15 }
 0x5a1   :  { %1213 = vrot.lane.b32.xlu0 %v1170_v20, %s1912_s15 }
 0x5a4   :  { %1219 = vrot.lane.b32.xlu1 %v2517_v19, %s1913_s6 }
 0x5a5   :  { %1221 = vrot.lane.b32.xlu0 %v1170_v20, %s1913_s6 }
 0x5a8   :  { %1227 = vrot.lane.b32.xlu1 %v2517_v19, %s1914_s16 }
 0x5a9   :  { %1229 = vrot.lane.b32.xlu0 %v1170_v20, %s1914_s16 }
 0x5fe   :  { %v1172_v1 = vpop.permute.xlu1 %1171 }
 0x5ff   :  { %v1174_v24 = vpop.permute.xlu0 %1173 }
 0x600   :  { %v1175_v27 = vsel %vm224_vm5, %v1172_v1, %v1174_v24  ;;  %v1176_v21 = vsel %vm224_vm5, %v1174_v24, %v1172_v1 }
 0x601   :  { %v1177_v30 = vmul.f32 %v1176_v21, %v2144_v55  ;;  %v1178_v31 = vmul.f32 %v1175_v27, %v2147_v56 }
 0x602   :  { %v1180_v4 = vpop.permute.xlu1 %1179 }
 0x603   :  { %v1182_v25 = vpop.permute.xlu0 %1181 }
 0x604   :  { %v1183_v28 = vsel %vm241_vm2, %v1180_v4, %v1182_v25  ;;  %v1184_v29 = vsel %vm241_vm2, %v1182_v25, %v1180_v4 }
 0x605   :  { %v1185_v36 = vmul.f32 %v1184_v29, %v2127_v47  ;;  %v1186_v38 = vmul.f32 %v1183_v28, %v2132_v50 }
 0x606   :  { %v1188_v37 = vpop.permute.xlu1 %1187 }
 0x607   :  { %v1697_v10 = vpack.c.bf16 %v1185_v36, %v1177_v30  ;;  %v1190_v11 = vpop.permute.xlu0 %1189  ;;  %v1695_v58 = vpack.c.bf16 %v1186_v38, %v1178_v31 }
 0x608   :  { %v1191_v59 = vsel %vm258_vm4, %v1188_v37, %v1190_v11  ;;  %v1192_v61 = vsel %vm258_vm4, %v1190_v11, %v1188_v37 }
 0x609   :  { %1696 = vmatprep.subr.bf16.mxu1 %v1695_v58  ;;  %v1193_v63 = vmul.f32 %v1192_v61, %v2174_v12  ;;  %v1194_v0 = vmul.f32 %v1191_v59, %v2150_v57 }
 0x60a   :  { %1698 = vmatpush1.bf16.msra.mxu1 %v1697_v10  ;;  %v1196_v6 = vpop.permute.xlu1 %1195 }
 0x60b   :  { %v1198_v33 = vpop.permute.xlu0 %1197 }
 0x60c   :  { %v1199_v43 = vsel %vm275_vm3, %v1196_v6, %v1198_v33  ;;  %v1200_v46 = vsel %vm275_vm3, %v1198_v33, %v1196_v6 }
 0x60d   :  { %v1201_v3 = vmul.f32 %v1200_v46, %v2156_v60  ;;  %v1202_v8 = vmul.f32 %v1199_v43, %v2138_v52 }
 0x60e   :  { %v1204_v15 = vpop.permute.xlu1 %1203 }
 0x60f   :  { %v1701_v22 = vpack.c.bf16 %v1201_v3, %v1193_v63  ;;  %v1206_v9 = vpop.permute.xlu0 %1205  ;;  %v1699_v23 = vpack.c.bf16 %v1202_v8, %v1194_v0  ;;  %v1919_v8 = vmov 6  }
 0x610   :  { %v1207_v51 = vsel %vm292_vm6, %v1204_v15, %v1206_v9  ;;  %v1208_v1 = vsel %vm292_vm6, %v1206_v9, %v1204_v15  ;;  %1758 = vset.pattern.permute.xlu1 %v1919_v8  ;;  %v1920_v15 = vmov 7  }
 0x611   :  { %v1209_v24 = vmul.f32 %v1207_v51, %v2180_v26  ;;  %v1210_v27 = vmul.f32 %v1208_v1, %v2159_v62  ;;  %1700 = vmatprep.subr.bf16.mxu1 %v1699_v23  ;;  %1759 = vset.pattern.permute.xlu0 %v1920_v15 }
 0x612   :  { %1702 = vmatpush1.bf16.msra.mxu1 %v1701_v22  ;;  %v1212_v21 = vpop.permute.xlu1 %1211 }
 0x613   :  { %v1705_v4 = vpack.c.bf16 %v1209_v24, %v2517_v19  ;;  %v1214_v25 = vpop.permute.xlu0 %1213  ;;  %v1703_v28 = vpack.c.bf16 %v1210_v27, %v1170_v20 }
 0x614   :  { %v1215_v29 = vsel %vm309_vm7, %v1212_v21, %v1214_v25  ;;  %v1216_v30 = vsel %vm309_vm7, %v1214_v25, %v1212_v21 }
 0x615   :  { %1704 = vmatprep.subr.bf16.mxu1 %v1703_v28  ;;  %v1217_v19 = vmul.f32 %v1215_v29, %v2192_v44  ;;  %v1218_v20 = vmul.f32 %v1216_v30, %v2194_v48 }
 0x616   :  { %1706 = vmatpush1.bf16.msra.mxu1 %v1705_v4  ;;  %v1220_v31 = vpop.permute.xlu1 %1219 }
 0x617   :  { %v1222_v36 = vpop.permute.xlu0 %1221 }
 0x618   :  { %v1223_v38 = vsel %vm326_vm8, %v1220_v31, %v1222_v36  ;;  %v1224_v37 = vsel %vm326_vm8, %v1222_v36, %v1220_v31 }
 0x619   :  { %v1225_v10 = vmul.f32 %v1223_v38, %v2198_v14  ;;  %v1226_v11 = vmul.f32 %v1224_v37, %v2200_v53 }
 0x61a   :  { %v1228_v58 = vpop.permute.xlu1 %1227 }
 0x61b   :  { %v1709_v59 = vpack.c.bf16 %v1225_v10, %v1217_v19  ;;  %v1230_v61 = vpop.permute.xlu0 %1229  ;;  %v1707_v6 = vpack.c.bf16 %v1226_v11, %v1218_v20 }
 0x61c   :  { %v1232_v33 = vsel %vm343_vm9, %v1230_v61, %v1228_v58  ;;  %v1231_v43 = vsel %vm343_vm9, %v1228_v58, %v1230_v61 }
 0x61d   :  { %v1234_v46 = vmul.f32 %v2219_v32, %v1232_v33  ;;  %1708 = vmatprep.subr.bf16.mxu1 %v1707_v6  ;;  %v1233_v63 = vmul.f32 %v2226_v13, %v1231_v43 }
 0x61e   :  { %1710 = vmatpush1.bf16.msra.mxu1 %v1709_v59 }
 0x61f   :  { %1251 = vmatprep.subr.mxu1 %v1234_v46 }
 0x622   :  { %1252 = vmatpush1.msra.mxu1 %v1233_v63 }
 0x623   :  { %1628 = vmatmul.mubr.msk.f32.vlgmr.msra.gmra.mrb[6].mxu1 %vm357_vm10, %v2320_v39 }
 0x62a   :  { %v2597_v0 = vpop.f32.mrb[4].mxu1 }
 0x62b   :  { %v2599_v3 = vpop.f32.mrb[5].mxu1 }
 0x6f6   :  { %v1301_v32 = vpop.f32.mrb[6].mxu1 }
 0x6f7   :  { %v1306_v22 = vmul.f32 %v1301_v32, %v2426_v5  ;;  %v1303_v9 = vpop.f32.mrb[7].mxu1 }
 0x6f8   :  { %v1307_v23 = vmul.f32 %v1303_v9, %v2426_v5  ;;  %v1776_v5 = vld [vmem:[#allocation6] sm:$0xff] }
 0x6f9   :  { %v1308_v51 = vadd.f32 %v1306_v22, %v2432_v17 }
 0x6fa   :  { %v1309_v39 = vadd.f32 %v1307_v23, %v2432_v17  ;;  %v2643_v17 = vld [vmem:[#allocation9] sm:$0xff] }
 0x6fb   :  { %v2607_v1 = vmax.f32 %v1308_v51, 0.0 }
 0x6fc   :  { %v2609_v24 = vmax.f32 %v1309_v39, 0.0 }
 0x6fd   :  { %1312 = vrot.lane.b32.xlu1 %v2607_v1, %s1907_s2 }
 0x6fe   :  { %1314 = vrot.lane.b32.xlu0 %v2609_v24, %s1907_s2 }
 0x701   :  { %1320 = vrot.lane.b32.xlu1 %v2607_v1, %s1908_s11 }
 0x702   :  { %1322 = vrot.lane.b32.xlu0 %v2609_v24, %s1908_s11 }
 0x705   :  { %1328 = vrot.lane.b32.xlu1 %v2607_v1, %s1909_s12 }
 0x706   :  { %1330 = vrot.lane.b32.xlu0 %v2609_v24, %s1909_s12 }
 0x709   :  { %1336 = vrot.lane.b32.xlu1 %v2607_v1, %s1910_s13 }
 0x70a   :  { %1338 = vrot.lane.b32.xlu0 %v2609_v24, %s1910_s13 }
 0x70d   :  { %1344 = vrot.lane.b32.xlu1 %v2607_v1, %s1911_s14 }
 0x70e   :  { %1346 = vrot.lane.b32.xlu0 %v2609_v24, %s1911_s14 }
 0x711   :  { %1352 = vrot.lane.b32.xlu1 %v2607_v1, %s1912_s15 }
 0x712   :  { %1354 = vrot.lane.b32.xlu0 %v2609_v24, %s1912_s15 }
 0x715   :  { %1360 = vrot.lane.b32.xlu1 %v2607_v1, %s1913_s6 }
 0x716   :  { %1362 = vrot.lane.b32.xlu0 %v2609_v24, %s1913_s6 }
 0x719   :  { %1368 = vrot.lane.b32.xlu1 %v2607_v1, %s1914_s16 }
 0x71a   :  { %1370 = vrot.lane.b32.xlu0 %v2609_v24, %s1914_s16 }
 0x71d   :  { %741 = vperm.xlu1 %1758, %v1776_v5  }
 0x71e   :  { %747 = vperm.xlu0 %1759, %v1776_v5  }
 0x721   :  { %1760 = vset.pattern.permute.xlu1 %v1905_v2 }
 0x722   :  { %820 = vperm.xlu1 %1760, %v2643_v17   ;;  %1762 = vset.pattern.permute.xlu0 %v1915_v34 }
 0x723   :  { %834 = vperm.xlu0 %1762, %v2643_v17  }
 0x726   :  { %1761 = vset.pattern.permute.xlu1 %v1906_v7 }
 0x727   :  { %826 = vperm.xlu1 %1761, %v2643_v17   ;;  %1765 = vset.pattern.permute.xlu0 %v1918_v49 }
 0x72b   :  { %1763 = vset.pattern.permute.xlu1 %v1916_v35 }
 0x72c   :  { %842 = vperm.xlu1 %1763, %v2643_v17  }
 0x730   :  { %1764 = vset.pattern.permute.xlu1 %v1917_v42 }
 0x76f   :  { %v1313_v27 = vpop.permute.xlu1 %1312 }
 0x770   :  { %v1315_v21 = vpop.permute.xlu0 %1314 }
 0x771   :  { %v1316_v4 = vsel %vm224_vm5, %v1313_v27, %v1315_v21  ;;  %v1317_v34 = vsel %vm224_vm5, %v1315_v21, %v1313_v27 }
 0x772   :  { %v1318_v49 = vmul.f32 %v1317_v34, %v2144_v55  ;;  %v1319_v42 = vmul.f32 %v1316_v4, %v2147_v56 }
 0x773   :  { %v1321_v25 = vpop.permute.xlu1 %1320 }
 0x774   :  { %v1323_v7 = vpop.permute.xlu0 %1322 }
 0x775   :  { %v1324_v28 = vsel %vm241_vm2, %v1321_v25, %v1323_v7  ;;  %v1325_v35 = vsel %vm241_vm2, %v1323_v7, %v1321_v25 }
 0x776   :  { %v1326_v29 = vmul.f32 %v1325_v35, %v2127_v47  ;;  %v1327_v30 = vmul.f32 %v1324_v28, %v2132_v50 }
 0x777   :  { %v1329_v31 = vpop.permute.xlu1 %1328 }
 0x778   :  { %v1713_v36 = vpack.c.bf16 %v1326_v29, %v1318_v49  ;;  %v1331_v38 = vpop.permute.xlu0 %1330  ;;  %v1711_v37 = vpack.c.bf16 %v1327_v30, %v1319_v42 }
 0x779   :  { %v1332_v19 = vsel %vm258_vm4, %v1329_v31, %v1331_v38  ;;  %v1333_v20 = vsel %vm258_vm4, %v1331_v38, %v1329_v31 }
 0x77a   :  { %1712 = vmatprep.subr.bf16.mxu0 %v1711_v37  ;;  %v1334_v61 = vmul.f32 %v1333_v20, %v2174_v12  ;;  %v1335_v6 = vmul.f32 %v1332_v19, %v2150_v57  ;;  %v2706_v20 = vld [vmem:[%s2998_s7 + $0x18] ss:$0 sm:$0xff] }
 0x77b   :  { %v1337_v10 = vpop.permute.xlu1 %1336  ;;  %1714 = vmatpush1.bf16.msra.mxu0 %v1713_v36 }
 0x77c   :  { %v1339_v11 = vpop.permute.xlu0 %1338 }
 0x77d   :  { %v1340_v58 = vsel %vm275_vm3, %v1337_v10, %v1339_v11  ;;  %v1341_v59 = vsel %vm275_vm3, %v1339_v11, %v1337_v10 }
 0x77e   :  { %v1342_v33 = vmul.f32 %v1341_v59, %v2156_v60  ;;  %v1343_v43 = vmul.f32 %v1340_v58, %v2138_v52 }
 0x77f   :  { %v1345_v46 = vpop.permute.xlu1 %1344 }
 0x780   :  { %v1717_v63 = vpack.c.bf16 %v1342_v33, %v1334_v61  ;;  %v1347_v32 = vpop.permute.xlu0 %1346  ;;  %v1715_v22 = vpack.c.bf16 %v1343_v43, %v1335_v6 }
 0x781   :  { %v1348_v9 = vsel %vm292_vm6, %v1345_v46, %v1347_v32  ;;  %v1349_v23 = vsel %vm292_vm6, %v1347_v32, %v1345_v46 }
 0x782   :  { %v1350_v51 = vmul.f32 %v1348_v9, %v2180_v26  ;;  %v1351_v39 = vmul.f32 %v1349_v23, %v2159_v62  ;;  %1716 = vmatprep.subr.bf16.mxu0 %v1715_v22  ;;  %v86_v22 = vld [vmem:[#allocation2] sm:$0x1] }
 0x783   :  { %v1353_v5 = vpop.permute.xlu1 %1352  ;;  %1718 = vmatpush1.bf16.msra.mxu0 %v1717_v63 }
 0x784   :  { %v1721_v27 = vpack.c.bf16 %v1350_v51, %v2607_v1  ;;  %v1355_v21 = vpop.permute.xlu0 %1354  ;;  %v1719_v4 = vpack.c.bf16 %v1351_v39, %v2609_v24 }
 0x785   :  { %v1356_v34 = vsel %vm309_vm7, %v1353_v5, %v1355_v21  ;;  %v1357_v25 = vsel %vm309_vm7, %v1355_v21, %v1353_v5 }
 0x786   :  { %1720 = vmatprep.subr.bf16.mxu0 %v1719_v4  ;;  %v1358_v1 = vmul.f32 %v1356_v34, %v2192_v44  ;;  %v1359_v24 = vmul.f32 %v1357_v25, %v2194_v48 }
 0x787   :  { %v1361_v7 = vpop.permute.xlu1 %1360  ;;  %1722 = vmatpush1.bf16.msra.mxu0 %v1721_v27 }
 0x788   :  { %v1363_v28 = vpop.permute.xlu0 %1362 }
 0x789   :  { %v1364_v35 = vsel %vm326_vm8, %v1361_v7, %v1363_v28  ;;  %v1365_v49 = vsel %vm326_vm8, %v1363_v28, %v1361_v7 }
 0x78a   :  { %v1366_v42 = vmul.f32 %v1364_v35, %v2198_v14  ;;  %v1367_v29 = vmul.f32 %v1365_v49, %v2200_v53 }
 0x78b   :  { %v1369_v30 = vpop.permute.xlu1 %1368 }
 0x78c   :  { %v1725_v31 = vpack.c.bf16 %v1366_v42, %v1358_v1  ;;  %v1371_v36 = vpop.permute.xlu0 %1370  ;;  %v1723_v38 = vpack.c.bf16 %v1367_v29, %v1359_v24 }
 0x78d   :  { %v1373_v37 = vsel %vm343_vm9, %v1371_v36, %v1369_v30  ;;  %v1372_v19 = vsel %vm343_vm9, %v1369_v30, %v1371_v36 }
 0x78e   :  { %v1375_v10 = vmul.f32 %v2706_v20, %v1373_v37  ;;  %1724 = vmatprep.subr.bf16.mxu0 %v1723_v38  ;;  %v1374_v11 = vmul.f32 %v2226_v13, %v1372_v19  ;;  %v1921_v13 = vmov 8  }
 0x78f   :  { %1726 = vmatpush1.bf16.msra.mxu0 %v1725_v31 }
 0x790   :  { %1392 = vmatprep.subr.mxu0 %v1375_v10 }
 0x793   :  { %1393 = vmatpush1.msra.mxu0 %v1374_v11 }
 0x794   :  { %1629 = vmatmul.mubr.msk.f32.vlgmr.msra.gmra.mrb[6].mxu0 %vm357_vm10, %v2515_v54 }
 0x79c   :  { %v742_v58 = vpop.permute.xlu1 %741 }
 0x79d   :  { %v744_v59 = vmul.f32 %v742_v58, %v2597_v0  ;;  %v745_v61 = vmul.f32 %v742_v58, %v2599_v3  ;;  %v748_v6 = vpop.permute.xlu0 %747 }
 0x79f   :  { %v750_v33 = vadd.f32 %v748_v6, %v744_v59  ;;  %v751_v43 = vadd.f32 %v748_v6, %v745_v61 }
 0x7a1   :  { %v2714_v46 = vmax.f32 %v750_v33, 0.0  ;;  %v2716_v63 = vmax.f32 %v751_v43, 0.0  ;;  %v2794_v9 = vpop.permute.xlu1 %820 }
 0x7a2   :  { %v2800_v39 = vpop.permute.xlu0 %834 }
 0x7a3   :  { %756 = vrot.lane.b32.xlu0 %v2716_v63, %s1907_s2  ;;  %754 = vrot.lane.b32.xlu1 %v2714_v46, %s1907_s2 }
 0x7a6   :  { %v2796_v23 = vpop.permute.xlu1 %826 }
 0x7a7   :  { %764 = vrot.lane.b32.xlu0 %v2716_v63, %s1908_s11  ;;  %762 = vrot.lane.b32.xlu1 %v2714_v46, %s1908_s11 }
 0x7ab   :  { %770 = vrot.lane.b32.xlu0 %v2714_v46, %s1909_s12  ;;  %850 = vperm.xlu1 %1764, %v2643_v17   ;;  %v2798_v51 = vpop.permute.xlu1 %842 }
 0x7af   :  { %858 = vperm.xlu0 %1765, %v2643_v17   ;;  %772 = vrot.lane.b32.xlu1 %v2716_v63, %s1909_s12 }
 0x7b0   :  { %1767 = vset.pattern.permute.xlu1 %v1920_v15 }
 0x7b3   :  { %778 = vrot.lane.b32.xlu0 %v2714_v46, %s1910_s13  ;;  %780 = vrot.lane.b32.xlu1 %v2716_v63, %s1910_s13 }
 0x7b4   :  { %1766 = vset.pattern.permute.xlu0 %v1919_v8 }
 0x7b7   :  { %866 = vperm.xlu0 %1766, %v2643_v17   ;;  %874 = vperm.xlu1 %1767, %v2643_v17  }
 0x7bb   :  { %788 = vrot.lane.b32.xlu0 %v2716_v63, %s1911_s14  ;;  %786 = vrot.lane.b32.xlu1 %v2714_v46, %s1911_s14 }
 0x7bc   :  { %1768 = vset.pattern.permute.xlu1 %v1921_v13  ;;  %1769 = vset.pattern.permute.xlu0 %v1905_v2 }
 0x7bf   :  { %794 = vrot.lane.b32.xlu0 %v2714_v46, %s1912_s15  ;;  %882 = vperm.xlu1 %1768, %v2643_v17  }
 0x7c3   :  { %796 = vrot.lane.b32.xlu1 %v2716_v63, %s1912_s15 }
 0x815   :  { %v755_v5 = vpop.permute.xlu1 %754  ;;  %v757_v27 = vpop.permute.xlu0 %756 }
 0x816   :  { %v758_v59 = vsel %vm224_vm5, %v755_v5, %v757_v27  ;;  %v759_v61 = vsel %vm224_vm5, %v757_v27, %v755_v5 }
 0x819   :  { %v763_v21 = vpop.permute.xlu1 %762  ;;  %v765_v34 = vpop.permute.xlu0 %764 }
 0x81a   :  { %v766_v19 = vsel %vm241_vm2, %v763_v21, %v765_v34  ;;  %v767_v10 = vsel %vm241_vm2, %v765_v34, %v763_v21 }
 0x81b   :  { %v768_v43 = vmul.f32 %v767_v10, %v2127_v47  ;;  %v769_v13 = vmul.f32 %v766_v19, %v2132_v50 }
 0x81d   :  { %v771_v7 = vpop.permute.xlu0 %770  ;;  %v829_v27 = vmul.f32 %v2796_v23, %v768_v43  ;;  %v830_v21 = vmul.f32 %v2796_v23, %v769_v13 }
 0x82a   :  { %v2802_v4 = vpop.permute.xlu1 %850 }
 0x82e   :  { %v773_v25 = vpop.permute.xlu1 %772  ;;  %v2804_v28 = vpop.permute.xlu0 %858 }
 0x82f   :  { %v775_v33 = vsel %vm258_vm4, %v773_v25, %v771_v7 }
 0x832   :  { %v781_v35 = vpop.permute.xlu1 %780  ;;  %v779_v49 = vpop.permute.xlu0 %778 }
 0x836   :  { %v2806_v1 = vpop.permute.xlu1 %874  ;;  %v2808_v24 = vpop.permute.xlu0 %866 }
 0x83a   :  { %v787_v42 = vpop.permute.xlu1 %786  ;;  %v789_v29 = vpop.permute.xlu0 %788 }
 0x83e   :  { %v2810_v30 = vpop.permute.xlu1 %882  ;;  %v2812_v31 = vpop.permute.xlu0 %794 }
 0x842   :  { %v2814_v36 = vpop.permute.xlu1 %796 }
 0x867   :  { %v1442_v54 = vpop.f32.mrb[6].mxu0 }
 0x868   :  { %v1447_v0 = vmul.f32 %v1442_v54, %v742_v58  ;;  %v1444_v3 = vpop.f32.mrb[7].mxu0  ;;  %v782_v54 = vsel %vm275_vm3, %v779_v49, %v781_v35 }
 0x869   :  { %v1448_v2 = vmul.f32 %v1444_v3, %v742_v58 }
 0x86a   :  { %v1449_v8 = vadd.f32 %v1447_v0, %v748_v6  ;;  %v783_v0 = vsel %vm275_vm3, %v781_v35, %v779_v49 }
 0x86b   :  { %v1450_v17 = vadd.f32 %v1448_v2, %v748_v6  ;;  %v774_v6 = vsel %vm258_vm4, %v771_v7, %v773_v25  ;;  %v760_v2 = vmul.f32 %v759_v61, %v2144_v55  ;;  %v784_v34 = vmul.f32 %v783_v0, %v2156_v60 }
 0x86c   :  { %v2750_v15 = vmax.f32 %v1449_v8, 0.0  ;;  %v777_v5 = vmul.f32 %v774_v6, %v2150_v57  ;;  %v785_v25 = vmul.f32 %v782_v54, %v2138_v52 }
 0x86d   :  { %v2764_v32 = vmax.f32 %v1450_v17, 0.0  ;;  %v761_v17 = vmul.f32 %v758_v59, %v2147_v56  ;;  %v823_v49 = vmul.f32 %v2794_v9, %v760_v2 }
 0x86e   :  { %1469 = vrot.lane.b32.xlu0 %v2750_v15, %s1909_s12  ;;  %1453 = vrot.lane.b32.xlu1 %v2750_v15, %s1907_s2  ;;  %v838_v59 = vmul.f32 %v2800_v39, %v777_v5  ;;  %v846_v43 = vmul.f32 %v2798_v51, %v785_v25 }
 0x86f   :  { %v824_v19 = vmul.f32 %v2794_v9, %v761_v17  ;;  %v831_v61 = vadd.f32 %v829_v27, %v823_v49 }
 0x871   :  { %v832_v6 = vadd.f32 %v830_v21, %v824_v19  ;;  %v854_v19 = vmul.f32 %v2802_v4, %v2716_v63 }
 0x872   :  { %1493 = vrot.lane.b32.xlu0 %v2750_v15, %s1912_s15  ;;  %1461 = vrot.lane.b32.xlu1 %v2750_v15, %s1908_s11 }
 0x873   :  { %v840_v17 = vadd.f32 %v838_v59, %v832_v6 }
 0x875   :  { %v848_v25 = vadd.f32 %v846_v43, %v840_v17 }
 0x876   :  { %1501 = vrot.lane.b32.xlu0 %v2750_v15, %s1913_s6  ;;  %1477 = vrot.lane.b32.xlu1 %v2750_v15, %s1910_s13 }
 0x877   :  { %v2882_v6 = vadd.f32 %v854_v19, %v848_v25 }
 0x87a   :  { %1455 = vrot.lane.b32.xlu0 %v2764_v32, %s1907_s2  ;;  %1485 = vrot.lane.b32.xlu1 %v2750_v15, %s1911_s14 }
 0x87e   :  { %1463 = vrot.lane.b32.xlu0 %v2764_v32, %s1908_s11  ;;  %804 = vrot.lane.b32.xlu1 %v2716_v63, %s1913_s6 }
 0x882   :  { %802 = vrot.lane.b32.xlu0 %v2714_v46, %s1913_s6  ;;  %1471 = vrot.lane.b32.xlu1 %v2764_v32, %s1909_s12 }
 0x886   :  { %1487 = vrot.lane.b32.xlu0 %v2764_v32, %s1911_s14  ;;  %1479 = vrot.lane.b32.xlu1 %v2764_v32, %s1910_s13 }
 0x88a   :  { %1509 = vrot.lane.b32.xlu0 %v2750_v15, %s1914_s16  ;;  %1495 = vrot.lane.b32.xlu1 %v2764_v32, %s1912_s15 }
 0x88e   :  { %810 = vrot.lane.b32.xlu0 %v2714_v46, %s1914_s16  ;;  %1503 = vrot.lane.b32.xlu1 %v2764_v32, %s1913_s6 }
 0x892   :  { %1511 = vrot.lane.b32.xlu1 %v2764_v32, %s1914_s16  ;;  %903 = vperm.xlu0 %1769, %v86_v22   ;;  %v776_v22 = vmul.f32 %v775_v33, %v2174_v12  ;;  %v845_v33 = vmul.f32 %v2798_v51, %v784_v34 }
 0x894   :  { %v837_v10 = vmul.f32 %v2800_v39, %v776_v22 }
 0x896   :  { %812 = vrot.lane.b32.xlu1 %v2716_v63, %s1914_s16  ;;  %v839_v18 = vadd.f32 %v837_v10, %v831_v61  ;;  %v790_v10 = vsel %vm292_vm6, %v787_v42, %v789_v29 }
 0x898   :  { %v847_v34 = vadd.f32 %v845_v33, %v839_v18 }
 0x8e0   :  { %v1454_v38 = vpop.permute.xlu1 %1453  ;;  %v1470_v37 = vpop.permute.xlu0 %1469 }
 0x8e4   :  { %v1462_v11 = vpop.permute.xlu1 %1461  ;;  %v2820_v58 = vpop.permute.xlu0 %1493 }
 0x8e8   :  { %v1478_v3 = vpop.permute.xlu1 %1477  ;;  %v2836_v8 = vpop.permute.xlu0 %1501 }
 0x8ec   :  { %v1486_v7 = vpop.permute.xlu1 %1485  ;;  %v1456_v35 = vpop.permute.xlu0 %1455 }
 0x8ed   :  { %v1457_v13 = vsel %vm224_vm5, %v1454_v38, %v1456_v35  ;;  %v1458_v54 = vsel %vm224_vm5, %v1456_v35, %v1454_v38  ;;  %v853_v35 = vmul.f32 %v2802_v4, %v2714_v46 }
 0x8ee   :  { %v1459_v49 = vmul.f32 %v1458_v54, %v2144_v55  ;;  %v1460_v38 = vmul.f32 %v1457_v13, %v2147_v56 }
 0x8ef   :  { %v2880_v61 = vadd.f32 %v853_v35, %v847_v34 }
 0x8f0   :  { %v805_v0 = vpop.permute.xlu1 %804  ;;  %v1464_v2 = vpop.permute.xlu0 %1463 }
 0x8f1   :  { %v1465_v22 = vsel %vm241_vm2, %v1462_v11, %v1464_v2  ;;  %v1466_v5 = vsel %vm241_vm2, %v1464_v2, %v1462_v11 }
 0x8f2   :  { %v1467_v27 = vmul.f32 %v1466_v5, %v2127_v47  ;;  %v1468_v21 = vmul.f32 %v1465_v22, %v2132_v50  ;;  %v791_v47 = vsel %vm292_vm6, %v789_v29, %v787_v42  ;;  %v1517_v42 = vmul.f32 %v1459_v49, %v2794_v9 }
 0x8f3   :  { %v1518_v29 = vmul.f32 %v1460_v38, %v2794_v9  ;;  %v793_v33 = vmul.f32 %v791_v47, %v2159_v62  ;;  %v798_v9 = vsel %vm309_vm7, %v2812_v31, %v2814_v36 }
 0x8f4   :  { %v1472_v11 = vpop.permute.xlu1 %1471  ;;  %v803_v50 = vpop.permute.xlu0 %802  ;;  %v1519_v18 = vmul.f32 %v1467_v27, %v2796_v23  ;;  %v1520_v55 = vmul.f32 %v1468_v21, %v2796_v23  ;;  %v792_v23 = vmul.f32 %v790_v10, %v2180_v26 }
 0x8f5   :  { %v1473_v56 = vsel %vm258_vm4, %v1470_v37, %v1472_v11  ;;  %v1474_v46 = vsel %vm258_vm4, %v1472_v11, %v1470_v37  ;;  %v807_v47 = vsel %vm326_vm8, %v805_v0, %v803_v50 }
 0x8f6   :  { %v1475_v63 = vmul.f32 %v1474_v46, %v2174_v12  ;;  %v1476_v59 = vmul.f32 %v1473_v56, %v2150_v57  ;;  %v1521_v54 = vadd.f32 %v1519_v18, %v1517_v42  ;;  %v1522_v57 = vadd.f32 %v1520_v55, %v1518_v29 }
 0x8f7   :  { %v861_v29 = vmul.f32 %v2804_v28, %v792_v23 }
 0x8f8   :  { %v1523_v43 = vmul.f32 %v1475_v63, %v2800_v39  ;;  %v1524_v37 = vmul.f32 %v1476_v59, %v2800_v39  ;;  %v1480_v13 = vpop.permute.xlu1 %1479  ;;  %v1488_v12 = vpop.permute.xlu0 %1487  ;;  %v799_v39 = vsel %vm309_vm7, %v2814_v36, %v2812_v31 }
 0x8f9   :  { %v1481_v2 = vsel %vm275_vm3, %v1478_v3, %v1480_v13  ;;  %v1482_v17 = vsel %vm275_vm3, %v1480_v13, %v1478_v3  ;;  %v1489_v34 = vsel %vm292_vm6, %v1486_v7, %v1488_v12  ;;  %v1490_v3 = vsel %vm292_vm6, %v1488_v12, %v1486_v7 }
 0x8fa   :  { %v1483_v22 = vmul.f32 %v1482_v17, %v2156_v60  ;;  %v1484_v5 = vmul.f32 %v1481_v2, %v2138_v52  ;;  %v1525_v27 = vadd.f32 %v1523_v43, %v1521_v54  ;;  %v1526_v21 = vadd.f32 %v1524_v37, %v1522_v57 }
 0x8fb   :  { %v1491_v38 = vmul.f32 %v1489_v34, %v2180_v26  ;;  %v1492_v31 = vmul.f32 %v1490_v3, %v2159_v62  ;;  %v800_v60 = vmul.f32 %v798_v9, %v2192_v44  ;;  %v801_v52 = vmul.f32 %v799_v39, %v2194_v48 }
 0x8fc   :  { %v1527_v25 = vmul.f32 %v1483_v22, %v2798_v51  ;;  %v1528_v49 = vmul.f32 %v1484_v5, %v2798_v51  ;;  %v1496_v36 = vpop.permute.xlu1 %1495  ;;  %v1531_v26 = vmul.f32 %v2750_v15, %v2802_v4  ;;  %v1532_v62 = vmul.f32 %v2764_v32, %v2802_v4 }
 0x8fd   :  { %v1497_v35 = vsel %vm309_vm7, %v2820_v58, %v1496_v36  ;;  %v1498_v7 = vsel %vm309_vm7, %v1496_v36, %v2820_v58  ;;  %v806_v51 = vsel %vm326_vm8, %v803_v50, %v805_v0  ;;  %v1535_v56 = vmul.f32 %v1491_v38, %v2804_v28  ;;  %v1510_v50 = vpop.permute.xlu0 %1509 }
 0x8fe   :  { %v1529_v19 = vadd.f32 %v1527_v25, %v1525_v27  ;;  %v1530_v10 = vadd.f32 %v1528_v49, %v1526_v21  ;;  %v1499_v11 = vmul.f32 %v1497_v35, %v2192_v44  ;;  %v1500_v18 = vmul.f32 %v1498_v7, %v2194_v48 }
 0x8ff   :  { %v1536_v46 = vmul.f32 %v1492_v31, %v2804_v28  ;;  %v862_v43 = vmul.f32 %v2804_v28, %v793_v33  ;;  %v808_v37 = vmul.f32 %v806_v51, %v2198_v14  ;;  %v809_v13 = vmul.f32 %v807_v47, %v2200_v53 }
 0x900   :  { %v1533_v55 = vadd.f32 %v1531_v26, %v1529_v19  ;;  %v1534_v58 = vadd.f32 %v1532_v62, %v1530_v10  ;;  %v1504_v15 = vpop.permute.xlu1 %1503  ;;  %v1539_v63 = vmul.f32 %v1499_v11, %v2808_v24  ;;  %v1540_v32 = vmul.f32 %v1500_v18, %v2808_v24 }
 0x901   :  { %v1505_v4 = vsel %vm326_vm8, %v2836_v8, %v1504_v15  ;;  %v1506_v44 = vsel %vm326_vm8, %v1504_v15, %v2836_v8  ;;  %v869_v17 = vmul.f32 %v2808_v24, %v800_v60  ;;  %v870_v9 = vmul.f32 %v2808_v24, %v801_v52  ;;  %v811_v34 = vpop.permute.xlu0 %810 }
 0x902   :  { %v1537_v48 = vadd.f32 %v1535_v56, %v1533_v55  ;;  %v1538_v0 = vadd.f32 %v1536_v46, %v1534_v58  ;;  %v1507_v59 = vmul.f32 %v1505_v4, %v2198_v14  ;;  %v1508_v42 = vmul.f32 %v1506_v44, %v2200_v53  ;;  %v1778_v14 = vld [vmem:[%s2998_s7 + $0x10] ss:$0 sm:$0xff] }
 0x903   :  { %v863_v39 = vadd.f32 %v861_v29, %v2880_v61  ;;  %v864_v22 = vadd.f32 %v862_v43, %v2882_v6  ;;  %v877_v5 = vmul.f32 %v2806_v1, %v808_v37  ;;  %v878_v24 = vmul.f32 %v2806_v1, %v809_v13 }
 0x904   :  { %v1541_v12 = vadd.f32 %v1539_v63, %v1537_v48  ;;  %v1542_v54 = vadd.f32 %v1540_v32, %v1538_v0  ;;  %v1543_v57 = vmul.f32 %v1507_v59, %v2806_v1  ;;  %v1544_v8 = vmul.f32 %v1508_v42, %v2806_v1  ;;  %v1512_v2 = vpop.permute.xlu1 %1511 }
 0x905   :  { %v1513_v23 = vsel %vm343_vm9, %v1510_v50, %v1512_v2  ;;  %v1514_v28 = vsel %vm343_vm9, %v1512_v2, %v1510_v50  ;;  %v871_v38 = vadd.f32 %v869_v17, %v863_v39  ;;  %v872_v31 = vadd.f32 %v870_v9, %v864_v22  ;;  %v3002_v17 = vld [vmem:[#allocation16_spill] sm:$0xff] }
 0x906   :  { %v1515_v53 = vmul.f32 %v1778_v14, %v1513_v23  ;;  %v1516_v33 = vmul.f32 %v2706_v20, %v1514_v28  ;;  %v1545_v27 = vadd.f32 %v1543_v57, %v1541_v12  ;;  %v1546_v21 = vadd.f32 %v1544_v8, %v1542_v54 }
 0x907   :  { %v879_v35 = vadd.f32 %v877_v5, %v871_v38  ;;  %v880_v7 = vadd.f32 %v878_v24, %v872_v31 }
 0x908   :  { %v1547_v3 = vmul.f32 %v1515_v53, %v2810_v30  ;;  %v1548_v25 = vmul.f32 %v1516_v33, %v2810_v30  ;;  %v813_v49 = vpop.permute.xlu1 %812 }
 0x909   :  { %v814_v36 = vsel %vm343_vm9, %v811_v34, %v813_v49  ;;  %v815_v61 = vsel %vm343_vm9, %v813_v49, %v811_v34 }
 0x90a   :  { %v1549_v6 = vadd.f32 %v1547_v3, %v1545_v27  ;;  %v1550_v60 = vadd.f32 %v1548_v25, %v1546_v21  ;;  %v816_v52 = vmul.f32 %v1778_v14, %v814_v36  ;;  %v817_v1 = vmul.f32 %v2706_v20, %v815_v61 }
 0x90c   :  { %v1551_v19 = vrot.slane %v1549_v6, 4  ;;  %v1557_v10 = vrot.slane %v1550_v60, 4  ;;  %v885_v26 = vmul.f32 %v2810_v30, %v816_v52  ;;  %v886_v62 = vmul.f32 %v2810_v30, %v817_v1  ;;  %v1779_v30 = vld [vmem:[%s2992_s1] sm:$0xf]  ;;  %s1922_s1 = smov [#allocation11]  }
 0x90d   :  { %v1568_v59 = vrot.slane %v1779_v30, %v2114_v41  ;;  %v1572_v42 = vrot.slane %v1779_v30, %v2120_v45  ;;  %v916_v2 = vrot.slane %v1779_v30, %v2052_v16  ;;  %v920_v9 = vrot.slane %v1779_v30, %v3002_v17  ;;  %s1604_s29 = sshll.u32 %s1922_s1, 4  ;;  %s1605_s29 = int_to_ptr.vmem [resolvable:$true] %s1604_s29 }
 0x90e   :  { %v1552_v51 = vadd.f32 %v1551_v19, %v1549_v6  ;;  %v1558_v47 = vadd.f32 %v1557_v10, %v1550_v60  ;;  %v887_v11 = vadd.f32 %v885_v26, %v879_v35  ;;  %v888_v18 = vadd.f32 %v886_v62, %v880_v7  ;;  %s1868_s4 = scalar_lea.vmem %s1605_s29, 64  ;;  %p1873_p5 = scmp.lt.s32.totalorder %s1605_s29, %s1605_s29 }
 0x90f   :  { %p1869_p4 = scmp.ne.s32.totalorder %s1605_s29, %s1868_s4  ;;  %p1874_p6 = scmp.lt.s32.totalorder %s1868_s4, %s1868_s4 }
 0x910   :  { %v1553_v55 = vrot.slane %v1552_v51, 2  ;;  %v1559_v40 = vrot.slane %v1558_v47, 2  ;;  %v889_v58 = vrot.slane %v887_v11, 4  ;;  %v895_v56 = vrot.slane %v888_v18, 4 }
 0x911   :  { %v904_v46 = vpop.permute.xlu0 %903  ;;  %p1875_p7 = por %p1874_p6, %p1873_p5 }
 0x912   :  { %v1554_v15 = vadd.f32 %v1553_v55, %v1552_v51  ;;  %v1560_v63 = vadd.f32 %v1559_v40, %v1558_v47  ;;  %v890_v20 = vadd.f32 %v889_v58, %v887_v11  ;;  %v896_v32 = vadd.f32 %v895_v56, %v888_v18 }
 0x913   :  { %v909_v4 = vrot.slane %v904_v46, %v2052_v16  ;;  %p1876_p8 = pnand %p1875_p7, %p1869_p4 }
 0x914   :  { %v891_v44 = vrot.slane %v890_v20, 2  ;;  %v897_v48 = vrot.slane %v896_v32, 2  ;;  %v1555_v0 = vrot.slane %v1554_v15, 1  ;;  %v1561_v50 = vrot.slane %v1560_v63, 1 }
 0x916   :  { %v892_v29 = vadd.f32 %v891_v44, %v890_v20  ;;  %v898_v43 = vadd.f32 %v897_v48, %v896_v32  ;;  %v1556_v37 = vadd.f32 %v1555_v0, %v1554_v15  ;;  %v1562_v13 = vadd.f32 %v1561_v50, %v1560_v63 }
 0x918   :  { %v893_v12 = vrot.slane %v892_v29, 1  ;;  %v899_v54 = vrot.slane %v898_v43, 1  ;;  %v1563_v57 = vadd.f32 %v1556_v37, %v909_v4  ;;  %v1564_v8 = vadd.f32 %v1562_v13, %v909_v4 }
 0x91a   :  { %v894_v23 = vadd.f32 %v893_v12, %v892_v29  ;;  %v900_v28 = vadd.f32 %v899_v54, %v898_v43  ;;  %v1575_v14 = vadd.f32 %v1568_v59, %v1563_v57  ;;  %v1576_v53 = vadd.f32 %v1572_v42, %v1564_v8 }
 0x91c   :  { %v910_v33 = vadd.f32 %v909_v4, %v894_v23  ;;  %v911_v41 = vadd.f32 %v909_v4, %v900_v28  ;;  %v1579_v22 = vrot.slane %v1575_v14, 7  ;;  %v1580_v5 = vrot.slane %v1576_v53, 7 }
 0x91e   :  { %v923_v45 = vadd.f32 %v916_v2, %v910_v33  ;;  %v924_v39 = vadd.f32 %v920_v9, %v911_v41 }
 0x920   :  { %v1584_v24 = vsel %vm1583_vm11, %v923_v45, %v1579_v22  ;;  %v1585_v27 = vsel %vm1583_vm11, %v924_v39, %v1580_v5 }
 0x921   :  { %v1588_v21 = vcombine.low %v1584_v24, %v1585_v27 }
 0x923   :  { %1630 = vst.sshfl [vmem:[#allocation11] sm:$0x33 pattern:$0x76325410] %v1588_v21 }
 0x924   :  { %1879 = shalt.err (!%p1876_p8)
}
 0x925   :  { %s1880_s28 = scalar_lea.hbm %s2999_s8, 64 }
 0x926   :  { %p1881_p9 = scmp.ne.s32.totalorder %s2999_s8, %s1880_s28  ;;  %p1884_p10 = scmp.lt.u32.totalorder %s1880_s28, %s2999_s8 }
 0x928   :  { %p1886_p11 = pnand %p1884_p10, %p1881_p9 }
 0x92a   :  { %1889 = shalt.err (!%p1886_p11)
}
 0x92b   :  { %1607 = dma.vmem_to_hbm [thread:$0]  %s1605_s29, 64, %s2999_s8, [#allocation5]  }
 0x92c   :  { %1896 = dma.done.wait [#allocation5], 64  }
 0x92d   :  { %1897 = vsyncadd [#allocation5], 4294967232 }
 0x92e   :  { %1611 = vsyncpa [#allocation4], 1 }
 0x92f   :  { %1612 = vsyncpa [#allocation7], 1 }
 0x930   :  { %1613 = vsyncpa [#allocation10], 1 }
 0x931   :  { %1614 = vsyncpa [#allocation5], 1 }

</bundles_post_ra>
